<compile_context>
chip_gen: v7x
topology: tpu7x:2x2x1
jax: 0.10.0
libtpu: 0.0.40
codegen_flags: <defaults>
</compile_context>

<pallas_src>
import functools

import jax
import jax.numpy as jnp
from jax.experimental import pallas as pl
from jax.experimental.pallas import tpu as pltpu


def _make_glu_conv_kernel(C, KH, KW, SH, SW, OW, th, OC):
    """Builds the kernel for fixed (static) geometry."""
    OC2 = 2 * OC
    PIX = th * OW

    def kernel(x_ref, w_ref, b_ref, o_ref):
        # x_ref: (1, Hp, Wp, C)    bf16 -- whole padded image of this batch elem
        # w_ref: (KH*KW, C, 2*OC)  bf16 -- fused conv1|conv2 weights per tap
        # b_ref: (1, 2*OC)         f32  -- fused biases
        # o_ref: (1, OC, th*OW)    f32  -- NCHW output tile, pixels flattened
        t = pl.program_id(1)
        h_base = t * (th * SH)          # first padded-input row for this tile
        if (th * SH) % 8 == 0:
            h_base = pl.multiple_of(h_base, 8)

        # Bias folded into the accumulator init; it broadcasts on the first add
        # so there is no standalone (PIX, 2*OC) bias-add pass.
        acc = b_ref[...].astype(jnp.float32)                 # (1, 2*OC)
        for kh in range(KH):
            for kw in range(KW):
                hs = (pl.ds(h_base + kh, th) if SH == 1
                      else pl.ds(h_base + kh, th, stride=SH))
                ws = (pl.ds(kw, OW) if SW == 1
                      else pl.ds(kw, OW, stride=SW))
                xs = x_ref[0, hs, ws, :]                     # (th, OW, C) bf16
                xs = xs.reshape(PIX, C)                      # lane dim (C) kept
                acc = acc + jnp.dot(xs, w_ref[kh * KW + kw],
                                    preferred_element_type=jnp.float32)

        # Transpose BEFORE the GLU: sigmoid/multiply then operate on lane-dense
        # (2*OC, PIX) data (PIX on the 128-lane axis) instead of lane-sparse
        # (PIX, 2*OC) vregs, and the store is channel-major + lane-dense.
        acc_t = jnp.transpose(acc, (1, 0))                   # (2*OC, PIX) f32
        gated = acc_t[:OC, :] * jax.nn.sigmoid(acc_t[OC:, :])  # (OC, PIX)
        o_ref[0] = gated.astype(o_ref.dtype)

    return kernel


def _choose_row_tile(OH, OW, C, Hp, Wp, OC,
                     target_pixels=1024, vmem_budget=20 * 1024 * 1024):
    """Output rows per grid step: as large as possible (amortize ~0.35us/step
    and hide DMA latency) under a rough VMEM budget, keeping th*OW a multiple
    of 128 unless a single tile covers all of OH (full-extent blocks are always
    legal). target_pixels ~1024 keeps the f32 accumulator's lane-padded
    footprint (PIX/8 vregs) from forcing heavy spill traffic when 2*OC << 128."""
    def vmem_cost(th):
        pix = th * OW
        resident = 2 * Hp * Wp * C * 2                # double-buffered bf16 image
        out_blk = 2 * OC * pix * 4                    # double-buffered f32 output
        temps = pix * (2 * OC) * 4 + 2 * pix * C * 2  # accumulator + tap slices
        return resident + out_blk + temps

    th = min(OH, max(1, target_pixels // max(OW, 1)))
    while th > 1 and vmem_cost(th) > vmem_budget:
        th -= 1
    if th >= OH:
        return OH
    while th > 1 and (th * OW) % 128 != 0:
        th -= 1
    return th if (th * OW) % 128 == 0 else OH


@functools.partial(jax.jit, static_argnames=("padding", "stride"))
def glu_conv2d(x, w1, b1, w2, b2, *, padding, stride):
    """x: (N, C, H, W) f32; w*: (OC, C, KH, KW); b*: (OC,). Returns NCHW f32."""
    N, C, H, W = x.shape
    OC, _, KH, KW = w1.shape
    PH, PW = padding
    SH, SW = stride
    OH = (H + 2 * PH - KH) // SH + 1
    OW = (W + 2 * PW - KW) // SW + 1
    Wp = W + 2 * PW

    th = _choose_row_tile(OH, OW, C, H + 2 * PH, Wp, OC)
    T = pl.cdiv(OH, th)
    OHp = T * th
    # Enough bottom padding that a padded final row tile never slices OOB;
    # the padded tail output rows are sliced off after the call.
    Hp = max(H + 2 * PH, (OHp - 1) * SH + KH)

    # NCHW -> padded NHWC bf16 (one fused XLA pass over x).
    xp = jnp.transpose(x, (0, 2, 3, 1))
    xp = jnp.pad(xp, ((0, 0), (PH, Hp - H - PH), (PW, PW), (0, 0)))
    xp = xp.astype(jnp.bfloat16)

    # Fused conv1|conv2 weights: (KH*KW, C, 2*OC) bf16; fused bias (1, 2*OC) f32.
    wf = jnp.concatenate([w1, w2], axis=0)               # (2*OC, C, KH, KW)
    wf = jnp.transpose(wf, (2, 3, 1, 0)).reshape(KH * KW, C, 2 * OC)
    wf = wf.astype(jnp.bfloat16)
    bf = jnp.concatenate([b1, b2], axis=0).reshape(1, 2 * OC).astype(jnp.float32)

    kernel = _make_glu_conv_kernel(C, KH, KW, SH, SW, OW, th, OC)

    # Raise the scoped-VMEM limit explicitly (v5e default is only 16 MiB) while
    # keeping headroom under v7x's 64 MiB physical VMEM.
    est = (2 * Hp * Wp * C * 2 + 2 * KH * KW * C * 2 * OC * 2
           + 2 * OC * th * OW * 4 + th * OW * (2 * OC * 4 + 2 * C * 2))
    vmem_limit = int(min(48 * 1024 * 1024, max(32 * 1024 * 1024, 4 * est)))

    out = pl.pallas_call(
        kernel,
        out_shape=jax.ShapeDtypeStruct((N, OC, OHp * OW), jnp.float32),
        grid_spec=pltpu.PrefetchScalarGridSpec(
            num_scalar_prefetch=0,
            grid=(N, T),
            in_specs=[
                # Whole padded image; block index depends only on n, so it is
                # DMA'd once per batch element and stays resident across tiles.
                pl.BlockSpec((1, Hp, Wp, C), lambda n, t: (n, 0, 0, 0)),
                pl.BlockSpec((KH * KW, C, 2 * OC), lambda n, t: (0, 0, 0)),
                pl.BlockSpec((1, 2 * OC), lambda n, t: (0, 0)),
            ],
            out_specs=pl.BlockSpec((1, OC, th * OW), lambda n, t: (n, 0, t)),
        ),
        compiler_params=pltpu.CompilerParams(
            dimension_semantics=("parallel", "parallel"),
            vmem_limit_bytes=vmem_limit,
        ),
    )(xp, wf, bf)

    out = out.reshape(N, OC, OHp, OW)      # already NCHW; reshape is free
    if OHp != OH:
        out = out[:, :, :OH, :]
    return out


def _init_conv_params(key, out_channels, in_channels, kh, kw):
    # Deterministic init mimicking PyTorch Conv2d default (uniform +- 1/sqrt(fan_in)).
    fan_in = in_channels * kh * kw
    bound = 1.0 / jnp.sqrt(jnp.float32(fan_in))
    kw_key, kb_key = jax.random.split(key)
    w = jax.random.uniform(kw_key, (out_channels, in_channels, kh, kw),
                           jnp.float32, -bound, bound)
    b = jax.random.uniform(kb_key, (out_channels,), jnp.float32, -bound, bound)
    return w, b


def _reference(x, w1, b1, w2, b2, padding, stride, cast=None):
    if cast is not None:
        x, w1, w2 = x.astype(cast), w1.astype(cast), w2.astype(cast)
    dn = ('NCHW', 'OIHW', 'NCHW')
    pad = [(padding[0], padding[0]), (padding[1], padding[1])]
    o1 = jax.lax.conv_general_dilated(x, w1, stride, pad, dimension_numbers=dn,
                                      preferred_element_type=jnp.float32)
    o1 = o1 + b1[None, :, None, None]
    o2 = jax.lax.conv_general_dilated(x, w2, stride, pad, dimension_numbers=dn,
                                      preferred_element_type=jnp.float32)
    o2 = o2 + b2[None, :, None, None]
    return o1 * jax.nn.sigmoid(o2)


if __name__ == "__main__":
    # GluConv2d(in_channels=4, out_channels=8, kernel_size=(3,3),
    #           padding=(1,1), stride=(1,1))
    in_channels, out_channels = 4, 8
    kernel_size = (3, 3)
    padding = (1, 1)
    stride = (1, 1)

    key = jax.random.PRNGKey(0)
    kx, k1, k2 = jax.random.split(key, 3)
    x = jax.random.normal(kx, (2, in_channels, 16, 16), jnp.float32)  # NCHW
    w1, b1 = _init_conv_params(k1, out_channels, in_channels, *kernel_size)
    w2, b2 = _init_conv_params(k2, out_channels, in_channels, *kernel_size)

    out = glu_conv2d(x, w1, b1, w2, b2, padding=padding, stride=stride)
    out = jax.block_until_ready(out)

    ref_f32 = _reference(x, w1, b1, w2, b2, padding, stride)
    ref_bf16 = _reference(x, w1, b1, w2, b2, padding, stride, cast=jnp.bfloat16)
    assert out.shape == ref_f32.shape == (2, out_channels, 16, 16)
    # Tight check against a bf16-operand / f32-accumulation reference.
    assert jnp.allclose(out, ref_bf16, atol=2e-3, rtol=2e-3), \
        float(jnp.max(jnp.abs(out - ref_bf16)))
    # Looser check against the pure-f32 reference (expected bf16 rounding).
    assert jnp.allclose(out, ref_f32, atol=5e-2, rtol=5e-2), \
        float(jnp.max(jnp.abs(out - ref_f32)))

    print("KERNEL_OK")
</pallas_src>

<mosaic_0001>
module attributes {stable_mosaic.version = 11 : i64} {
  func.func @kernel(%arg0: i32, %arg1: i32, %arg2: memref<1x18x18x4xbf16, #tpu.memory_space<vmem>>, %arg3: memref<9x4x16xbf16, #tpu.memory_space<vmem>>, %arg4: memref<1x16xf32, #tpu.memory_space<vmem>>, %arg5: memref<1x8x256xf32, #tpu.memory_space<vmem>>) attributes {dimension_semantics = [#tpu.dimension_semantics<parallel>, #tpu.dimension_semantics<parallel>], iteration_bounds = array<i64: 2, 1>, scalar_prefetch = 0 : i64, scratch_operands = 0 : i64, tpu.core_type = #tpu.core_type<tc>, window_params = [{transform_indices = @transform_0, window_bounds = array<i64: 1, 18, 18, 4>}, {pipeline_mode = #tpu.pipeline_mode<synchronous>, transform_indices = @transform_1, window_bounds = array<i64: 9, 4, 16>}, {pipeline_mode = #tpu.pipeline_mode<synchronous>, transform_indices = @transform_2, window_bounds = array<i64: 1, 16>}, {transform_indices = @transform_3, window_bounds = array<i64: 1, 8, 256>}]} {
    %c16_i32 = arith.constant 16 : i32
    %0 = arith.muli %arg1, %c16_i32 : i32
    %1 = tpu.assume_multiple %0, 8 : i32
    %c0 = arith.constant 0 : index
    %c0_0 = arith.constant 0 : index
    %2 = vector.load %arg4[%c0, %c0_0] : memref<1x16xf32, #tpu.memory_space<vmem>>, vector<1x16xf32>
    %c0_i32 = arith.constant 0 : i32
    %3 = arith.addi %1, %c0_i32 : i32
    %c0_1 = arith.constant 0 : index
    %4 = arith.index_cast %3 : i32 to index
    %c0_2 = arith.constant 0 : index
    %c0_3 = arith.constant 0 : index
    %5 = vector.load %arg2[%c0_1, %4, %c0_2, %c0_3] : memref<1x18x18x4xbf16, #tpu.memory_space<vmem>>, vector<1x16x16x4xbf16>
    %6 = vector.shape_cast %5 : vector<1x16x16x4xbf16> to vector<16x16x4xbf16>
    %7 = vector.shape_cast %6 : vector<16x16x4xbf16> to vector<256x4xbf16>
    %c0_4 = arith.constant 0 : index
    %c0_5 = arith.constant 0 : index
    %c0_6 = arith.constant 0 : index
    %8 = vector.load %arg3[%c0_4, %c0_5, %c0_6] : memref<9x4x16xbf16, #tpu.memory_space<vmem>>, vector<1x4x16xbf16>
    %9 = vector.shape_cast %8 : vector<1x4x16xbf16> to vector<4x16xbf16>
    %cst = arith.constant dense<0.000000e+00> : vector<256x16xf32>
    %10 = tpu.matmul %7, %9, %cst {dimension_numbers = #tpu.dot_dimension_numbers<[1], [0], [0], [1], [0, 0, 1, 1], [], []>} : vector<256x4xbf16>, vector<4x16xbf16>, vector<256x16xf32> -> vector<256x16xf32>
    %11 = vector.broadcast %2 : vector<1x16xf32> to vector<256x16xf32>
    %12 = arith.addf %11, %10 : vector<256x16xf32>
    %c0_i32_7 = arith.constant 0 : i32
    %13 = arith.addi %1, %c0_i32_7 : i32
    %c0_8 = arith.constant 0 : index
    %14 = arith.index_cast %13 : i32 to index
    %c1 = arith.constant 1 : index
    %c0_9 = arith.constant 0 : index
    %15 = vector.load %arg2[%c0_8, %14, %c1, %c0_9] : memref<1x18x18x4xbf16, #tpu.memory_space<vmem>>, vector<1x16x16x4xbf16>
    %16 = vector.shape_cast %15 : vector<1x16x16x4xbf16> to vector<16x16x4xbf16>
    %17 = vector.shape_cast %16 : vector<16x16x4xbf16> to vector<256x4xbf16>
    %c1_10 = arith.constant 1 : index
    %c0_11 = arith.constant 0 : index
    %c0_12 = arith.constant 0 : index
    %18 = vector.load %arg3[%c1_10, %c0_11, %c0_12] : memref<9x4x16xbf16, #tpu.memory_space<vmem>>, vector<1x4x16xbf16>
    %19 = vector.shape_cast %18 : vector<1x4x16xbf16> to vector<4x16xbf16>
    %cst_13 = arith.constant dense<0.000000e+00> : vector<256x16xf32>
    %20 = tpu.matmul %17, %19, %cst_13 {dimension_numbers = #tpu.dot_dimension_numbers<[1], [0], [0], [1], [0, 0, 1, 1], [], []>} : vector<256x4xbf16>, vector<4x16xbf16>, vector<256x16xf32> -> vector<256x16xf32>
    %21 = arith.addf %12, %20 : vector<256x16xf32>
    %c0_i32_14 = arith.constant 0 : i32
    %22 = arith.addi %1, %c0_i32_14 : i32
    %c0_15 = arith.constant 0 : index
    %23 = arith.index_cast %22 : i32 to index
    %c2 = arith.constant 2 : index
    %c0_16 = arith.constant 0 : index
    %24 = vector.load %arg2[%c0_15, %23, %c2, %c0_16] : memref<1x18x18x4xbf16, #tpu.memory_space<vmem>>, vector<1x16x16x4xbf16>
    %25 = vector.shape_cast %24 : vector<1x16x16x4xbf16> to vector<16x16x4xbf16>
    %26 = vector.shape_cast %25 : vector<16x16x4xbf16> to vector<256x4xbf16>
    %c2_17 = arith.constant 2 : index
    %c0_18 = arith.constant 0 : index
    %c0_19 = arith.constant 0 : index
    %27 = vector.load %arg3[%c2_17, %c0_18, %c0_19] : memref<9x4x16xbf16, #tpu.memory_space<vmem>>, vector<1x4x16xbf16>
    %28 = vector.shape_cast %27 : vector<1x4x16xbf16> to vector<4x16xbf16>
    %cst_20 = arith.constant dense<0.000000e+00> : vector<256x16xf32>
    %29 = tpu.matmul %26, %28, %cst_20 {dimension_numbers = #tpu.dot_dimension_numbers<[1], [0], [0], [1], [0, 0, 1, 1], [], []>} : vector<256x4xbf16>, vector<4x16xbf16>, vector<256x16xf32> -> vector<256x16xf32>
    %30 = arith.addf %21, %29 : vector<256x16xf32>
    %c1_i32 = arith.constant 1 : i32
    %31 = arith.addi %1, %c1_i32 : i32
    %c0_21 = arith.constant 0 : index
    %32 = arith.index_cast %31 : i32 to index
    %c0_22 = arith.constant 0 : index
    %c0_23 = arith.constant 0 : index
    %33 = vector.load %arg2[%c0_21, %32, %c0_22, %c0_23] : memref<1x18x18x4xbf16, #tpu.memory_space<vmem>>, vector<1x16x16x4xbf16>
    %34 = vector.shape_cast %33 : vector<1x16x16x4xbf16> to vector<16x16x4xbf16>
    %35 = vector.shape_cast %34 : vector<16x16x4xbf16> to vector<256x4xbf16>
    %c3 = arith.constant 3 : index
    %c0_24 = arith.constant 0 : index
    %c0_25 = arith.constant 0 : index
    %36 = vector.load %arg3[%c3, %c0_24, %c0_25] : memref<9x4x16xbf16, #tpu.memory_space<vmem>>, vector<1x4x16xbf16>
    %37 = vector.shape_cast %36 : vector<1x4x16xbf16> to vector<4x16xbf16>
    %cst_26 = arith.constant dense<0.000000e+00> : vector<256x16xf32>
    %38 = tpu.matmul %35, %37, %cst_26 {dimension_numbers = #tpu.dot_dimension_numbers<[1], [0], [0], [1], [0, 0, 1, 1], [], []>} : vector<256x4xbf16>, vector<4x16xbf16>, vector<256x16xf32> -> vector<256x16xf32>
    %39 = arith.addf %30, %38 : vector<256x16xf32>
    %c1_i32_27 = arith.constant 1 : i32
    %40 = arith.addi %1, %c1_i32_27 : i32
    %c0_28 = arith.constant 0 : index
    %41 = arith.index_cast %40 : i32 to index
    %c1_29 = arith.constant 1 : index
    %c0_30 = arith.constant 0 : index
    %42 = vector.load %arg2[%c0_28, %41, %c1_29, %c0_30] : memref<1x18x18x4xbf16, #tpu.memory_space<vmem>>, vector<1x16x16x4xbf16>
    %43 = vector.shape_cast %42 : vector<1x16x16x4xbf16> to vector<16x16x4xbf16>
    %44 = vector.shape_cast %43 : vector<16x16x4xbf16> to vector<256x4xbf16>
    %c4 = arith.constant 4 : index
    %c0_31 = arith.constant 0 : index
    %c0_32 = arith.constant 0 : index
    %45 = vector.load %arg3[%c4, %c0_31, %c0_32] : memref<9x4x16xbf16, #tpu.memory_space<vmem>>, vector<1x4x16xbf16>
    %46 = vector.shape_cast %45 : vector<1x4x16xbf16> to vector<4x16xbf16>
    %cst_33 = arith.constant dense<0.000000e+00> : vector<256x16xf32>
    %47 = tpu.matmul %44, %46, %cst_33 {dimension_numbers = #tpu.dot_dimension_numbers<[1], [0], [0], [1], [0, 0, 1, 1], [], []>} : vector<256x4xbf16>, vector<4x16xbf16>, vector<256x16xf32> -> vector<256x16xf32>
    %48 = arith.addf %39, %47 : vector<256x16xf32>
    %c1_i32_34 = arith.constant 1 : i32
    %49 = arith.addi %1, %c1_i32_34 : i32
    %c0_35 = arith.constant 0 : index
    %50 = arith.index_cast %49 : i32 to index
    %c2_36 = arith.constant 2 : index
    %c0_37 = arith.constant 0 : index
    %51 = vector.load %arg2[%c0_35, %50, %c2_36, %c0_37] : memref<1x18x18x4xbf16, #tpu.memory_space<vmem>>, vector<1x16x16x4xbf16>
    %52 = vector.shape_cast %51 : vector<1x16x16x4xbf16> to vector<16x16x4xbf16>
    %53 = vector.shape_cast %52 : vector<16x16x4xbf16> to vector<256x4xbf16>
    %c5 = arith.constant 5 : index
    %c0_38 = arith.constant 0 : index
    %c0_39 = arith.constant 0 : index
    %54 = vector.load %arg3[%c5, %c0_38, %c0_39] : memref<9x4x16xbf16, #tpu.memory_space<vmem>>, vector<1x4x16xbf16>
    %55 = vector.shape_cast %54 : vector<1x4x16xbf16> to vector<4x16xbf16>
    %cst_40 = arith.constant dense<0.000000e+00> : vector<256x16xf32>
    %56 = tpu.matmul %53, %55, %cst_40 {dimension_numbers = #tpu.dot_dimension_numbers<[1], [0], [0], [1], [0, 0, 1, 1], [], []>} : vector<256x4xbf16>, vector<4x16xbf16>, vector<256x16xf32> -> vector<256x16xf32>
    %57 = arith.addf %48, %56 : vector<256x16xf32>
    %c2_i32 = arith.constant 2 : i32
    %58 = arith.addi %1, %c2_i32 : i32
    %c0_41 = arith.constant 0 : index
    %59 = arith.index_cast %58 : i32 to index
    %c0_42 = arith.constant 0 : index
    %c0_43 = arith.constant 0 : index
    %60 = vector.load %arg2[%c0_41, %59, %c0_42, %c0_43] : memref<1x18x18x4xbf16, #tpu.memory_space<vmem>>, vector<1x16x16x4xbf16>
    %61 = vector.shape_cast %60 : vector<1x16x16x4xbf16> to vector<16x16x4xbf16>
    %62 = vector.shape_cast %61 : vector<16x16x4xbf16> to vector<256x4xbf16>
    %c6 = arith.constant 6 : index
    %c0_44 = arith.constant 0 : index
    %c0_45 = arith.constant 0 : index
    %63 = vector.load %arg3[%c6, %c0_44, %c0_45] : memref<9x4x16xbf16, #tpu.memory_space<vmem>>, vector<1x4x16xbf16>
    %64 = vector.shape_cast %63 : vector<1x4x16xbf16> to vector<4x16xbf16>
    %cst_46 = arith.constant dense<0.000000e+00> : vector<256x16xf32>
    %65 = tpu.matmul %62, %64, %cst_46 {dimension_numbers = #tpu.dot_dimension_numbers<[1], [0], [0], [1], [0, 0, 1, 1], [], []>} : vector<256x4xbf16>, vector<4x16xbf16>, vector<256x16xf32> -> vector<256x16xf32>
    %66 = arith.addf %57, %65 : vector<256x16xf32>
    %c2_i32_47 = arith.constant 2 : i32
    %67 = arith.addi %1, %c2_i32_47 : i32
    %c0_48 = arith.constant 0 : index
    %68 = arith.index_cast %67 : i32 to index
    %c1_49 = arith.constant 1 : index
    %c0_50 = arith.constant 0 : index
    %69 = vector.load %arg2[%c0_48, %68, %c1_49, %c0_50] : memref<1x18x18x4xbf16, #tpu.memory_space<vmem>>, vector<1x16x16x4xbf16>
    %70 = vector.shape_cast %69 : vector<1x16x16x4xbf16> to vector<16x16x4xbf16>
    %71 = vector.shape_cast %70 : vector<16x16x4xbf16> to vector<256x4xbf16>
    %c7 = arith.constant 7 : index
    %c0_51 = arith.constant 0 : index
    %c0_52 = arith.constant 0 : index
    %72 = vector.load %arg3[%c7, %c0_51, %c0_52] : memref<9x4x16xbf16, #tpu.memory_space<vmem>>, vector<1x4x16xbf16>
    %73 = vector.shape_cast %72 : vector<1x4x16xbf16> to vector<4x16xbf16>
    %cst_53 = arith.constant dense<0.000000e+00> : vector<256x16xf32>
    %74 = tpu.matmul %71, %73, %cst_53 {dimension_numbers = #tpu.dot_dimension_numbers<[1], [0], [0], [1], [0, 0, 1, 1], [], []>} : vector<256x4xbf16>, vector<4x16xbf16>, vector<256x16xf32> -> vector<256x16xf32>
    %75 = arith.addf %66, %74 : vector<256x16xf32>
    %c2_i32_54 = arith.constant 2 : i32
    %76 = arith.addi %1, %c2_i32_54 : i32
    %c0_55 = arith.constant 0 : index
    %77 = arith.index_cast %76 : i32 to index
    %c2_56 = arith.constant 2 : index
    %c0_57 = arith.constant 0 : index
    %78 = vector.load %arg2[%c0_55, %77, %c2_56, %c0_57] : memref<1x18x18x4xbf16, #tpu.memory_space<vmem>>, vector<1x16x16x4xbf16>
    %79 = vector.shape_cast %78 : vector<1x16x16x4xbf16> to vector<16x16x4xbf16>
    %80 = vector.shape_cast %79 : vector<16x16x4xbf16> to vector<256x4xbf16>
    %c8 = arith.constant 8 : index
    %c0_58 = arith.constant 0 : index
    %c0_59 = arith.constant 0 : index
    %81 = vector.load %arg3[%c8, %c0_58, %c0_59] : memref<9x4x16xbf16, #tpu.memory_space<vmem>>, vector<1x4x16xbf16>
    %82 = vector.shape_cast %81 : vector<1x4x16xbf16> to vector<4x16xbf16>
    %cst_60 = arith.constant dense<0.000000e+00> : vector<256x16xf32>
    %83 = tpu.matmul %80, %82, %cst_60 {dimension_numbers = #tpu.dot_dimension_numbers<[1], [0], [0], [1], [0, 0, 1, 1], [], []>} : vector<256x4xbf16>, vector<4x16xbf16>, vector<256x16xf32> -> vector<256x16xf32>
    %84 = arith.addf %75, %83 : vector<256x16xf32>
    %85 = tpu.transpose %84, [1, 0] : vector<256x16xf32> -> vector<16x256xf32>
    %86 = vector.extract_strided_slice %85 {offsets = [0, 0], sizes = [8, 256], strides = [1, 1]} : vector<16x256xf32> to vector<8x256xf32>
    %87 = vector.extract_strided_slice %85 {offsets = [8, 0], sizes = [8, 256], strides = [1, 1]} : vector<16x256xf32> to vector<8x256xf32>
    %88 = arith.negf %87 : vector<8x256xf32>
    %89 = math.exp %88 : vector<8x256xf32>
    %cst_61 = arith.constant 1.000000e+00 : f32
    %90 = vector.broadcast %cst_61 : f32 to vector<8x256xf32>
    %91 = arith.addf %90, %89 : vector<8x256xf32>
    %92 = arith.divf %90, %91 : vector<8x256xf32>
    %93 = arith.mulf %86, %92 : vector<8x256xf32>
    %c0_62 = arith.constant 0 : index
    %c0_63 = arith.constant 0 : index
    %c0_64 = arith.constant 0 : index
    %94 = vector.load %arg5[%c0_62, %c0_63, %c0_64] : memref<1x8x256xf32, #tpu.memory_space<vmem>>, vector<1x8x256xf32>
    %95 = vector.shape_cast %94 : vector<1x8x256xf32> to vector<8x256xf32>
    %96 = vector.shape_cast %93 : vector<8x256xf32> to vector<1x8x256xf32>
    tpu.vector_store %arg5[%c0_62, %c0_63, %c0_64], %96 {strides = array<i32>} : memref<1x8x256xf32, #tpu.memory_space<vmem>>, vector<1x8x256xf32>,
    return
  }
  func.func @transform_0(%arg0: i32, %arg1: i32) -> (i32, i32, i32, i32) {
    %c0_i32 = arith.constant 0 : i32
    %c0_i32_0 = arith.constant 0 : i32
    %c0_i32_1 = arith.constant 0 : i32
    %c0_i32_2 = arith.constant 0 : i32
    return %arg0, %c0_i32, %c0_i32_0, %c0_i32_1 : i32, i32, i32, i32
  }
  func.func @transform_1(%arg0: i32, %arg1: i32) -> (i32, i32, i32) {
    %c0_i32 = arith.constant 0 : i32
    %c0_i32_0 = arith.constant 0 : i32
    %c0_i32_1 = arith.constant 0 : i32
    %c0_i32_2 = arith.constant 0 : i32
    return %c0_i32, %c0_i32_0, %c0_i32_1 : i32, i32, i32
  }
  func.func @transform_2(%arg0: i32, %arg1: i32) -> (i32, i32) {
    %c0_i32 = arith.constant 0 : i32
    %c0_i32_0 = arith.constant 0 : i32
    %c0_i32_1 = arith.constant 0 : i32
    return %c0_i32, %c0_i32_0 : i32, i32
  }
  func.func @transform_3(%arg0: i32, %arg1: i32) -> (i32, i32, i32) {
    %c0_i32 = arith.constant 0 : i32
    %c0_i32_0 = arith.constant 0 : i32
    return %arg0, %c0_i32, %arg1 : i32, i32, i32
  }
}

</mosaic_0001>

<bundles_post_ra>
// kernel: glu_conv2d.1
= control target key start
LH: loop header
LB: loop body
LE: loop exit
PB: predicated region body
PF: predicated region fallthrough
CT: control target
= control target key end

     0   :  { %s6504_s12 = smov 0   ;;  %s6506_s13 = smov 0   ;;  %s8153_s0 = inlined_call_operand.vmem [shape: bf16[2,18,18,4], index: 0, kind: input, shape index: {}]   ;;  %s8154_s1 = inlined_call_operand.vmem [shape: bf16[9,4,16], index: 1, kind: input, shape index: {}]   ;;  %s8155_s2 = inlined_call_operand.vmem [shape: f32[1,16], index: 2, kind: input, shape index: {}]   ;;  %s8156_s3 = inlined_call_operand.vmem [shape: f32[2,8,256], index: 3, kind: output, shape index: {}]  }
   0x1   :  { %s6508_s14 = smov 0  }
   0x2 LB: > { %s25_s15 = sadd.s32 1, %s6478_s13  ;;  %p5058_p0 = scmp.ge.s32.totalorder %s6482_s14, 1  ;;  %s6482_s14 = sphi %s6508_s14, %s13_s14   ;;  %s6478_s13 = sphi %s6506_s13, %s8164_s13   ;;  %s6474_s12 = sphi %s6504_s12, %s8163_s12  }
   0x3   : > { %p27_p1 = scmp.ge.s32.totalorder %s25_s15, 2  ;;  %p151_p2 = scmp.lt.s32.totalorder %s6482_s14, 3 }
   0x5   : > { %s8166_s15 = smov (%p27_p1, %s25_s15), 0  ;;  %p152_p3 = pnand %p5058_p0, %p151_p2 }
   0x6   : > { %v232_v0 = vld [vmem:[%s8154_s1] sm:$0x3] (!%p152_p3)  ;;  %vm362_vm0 = vcmask (!%p152_p3), 1041408   ;;  %p179_p4 = scmp.lt.s32.totalorder (!%p152_p3), %s6474_s12, 1  ;;  %v5290_v2 = vld [vmem:[%s8154_s1 + $0x8] sm:$0x3] (!%p152_p3) }
   0x7   : > { %155 = sbr.rel (%p152_p3) target bundleno = 674 (0x2a2), region = 32  ;;  %6353 = vmatprep.subr.msk.bf16.mxu1 (!%p152_p3), %vm362_vm0, %v232_v0  ;;  %v364_v1 = vsel (!%p152_p3), %vm362_vm0, %v232_v0, 0  ;;  %v5095_v3 = vld [vmem:[%s8154_s1 + $0x2] sm:$0x3] (!%p152_p3)  ;;  %6357 = vmatprep.subr.msk.bf16.mxu0 (!%p152_p3), %vm362_vm0, %v5290_v2  ;;  %v6537_v4 = vsel (!%p152_p3), %vm362_vm0, %v5290_v2, 0  ;;  %vm313_vm1 = vcmask (!%p152_p3), 31744  }
   0x8   : > { %5758 = vmatpush3.bf16.msra.mxu1 (!%p152_p3), %v364_v1  ;;  %5894 = vmatpush3.bf16.msra.mxu0 (!%p152_p3), %v6537_v4  ;;  %v5355_v5 = vld [vmem:[%s8154_s1 + $0xa] sm:$0x3] (!%p152_p3)  ;;  %vm613_vm2 = vsmask.f32 (!%p152_p3), 3328  ;;  %vm614_vm3 = vsmask.f32 (!%p152_p3), 7440 }
   0x9   : > { %6354 = vmatprep.subr.msk.bf16.mxu1 (!%p152_p3), %vm362_vm0, %v5095_v3  ;;  %6359 = vmatprep.subr.msk.bf16.mxu0 (!%p152_p3), %vm362_vm0, %v5355_v5  ;;  %v6554_v6 = vld [vmem:[%s8154_s1 + $0xc] sm:$0x3] (!%p152_p3)  ;;  %v5144_v8 = vld [vmem:[%s8154_s1 + $0x4] sm:$0x3] (!%p152_p3)  ;;  %v1099_v10 = vsel (!%p152_p3), %vm362_vm0, %v5095_v3, 0  ;;  %v6566_v12 = vsel (!%p152_p3), %vm362_vm0, %v5355_v5, 0  ;;  %vm6606_vm4 = vmor (!%p152_p3), %vm613_vm2, %vm614_vm3 }
   0xa   : > { %v6570_v13 = vsel (!%p152_p3), %vm362_vm0, %v6554_v6, 0  ;;  %v6587_v22 = vld [vmem:[%s8154_s1 + $0xe] sm:$0x3] (!%p152_p3)  ;;  %v6595_v27 = vsel (!%p152_p3), %vm362_vm0, %v5144_v8, 0  ;;  %vm1358_vm5 = vcmask (!%p152_p3), 1042432   ;;  %vm1359_vm6 = vcmask (!%p152_p3), 1046532  }
   0xb   : > { %v6613_v46 = vsel (!%p152_p3), %vm362_vm0, %v6587_v22, 0  ;;  %vm6733_vm7 = vmor (!%p152_p3), %vm1358_vm5, %vm1359_vm6 }
   0xe   : > { %s8168_s12 = smov (!%p179_p4, %s6474_s12), 1 }
   0xf   : > { %s6363_s24 = smul.u32 216, %s8168_s12  ;;  %s5603_s19 = sshll.u32 %s8168_s12, 4 }
  0x10   : > { %s192_s22 = scalar_lea.vmem %s8156_s3, %s5603_s19 }
  0x11   : > { %s6549_s27 = scalar_lea.vmem %s8153_s0, %s6363_s24 }
  0x12   : > { %v6388_v7 = vld [vmem:[%s6549_s27] sm:$0xff]   ;;  %v6389_v9 = vld [vmem:[%s6549_s27 + $0xc] sm:$0xff]   ;;  %v6390_v11 = vld [vmem:[%s6549_s27 + $0x18] sm:$0xff]  }
  0x13   : > { %5759 = vmatprep.mubr.msk.bf16.mxu1 %vm313_vm1, %v6388_v7  ;;  %v5242_v14 = vld [vmem:[%s6549_s27 + $0xc] sm:$0xf]  ;;  %v6575_v15 = vld [vmem:[%s6549_s27 + $0x10] sm:$0xf]  ;;  %v6578_v16 = vld [vmem:[%s6549_s27 + $0x14] sm:$0x1] }
  0x14   : > { %5760 = vmatmul.mubr.msk.bf16.vlgmr.msra.gmra.mrb[0].mxu1 %vm313_vm1, %v6389_v9  ;;  %v2178_v17 = vshrl.u32 %v5242_v14, 16  ;;  %v2181_v18 = vshll.u32 %v5242_v14, 16  ;;  %v2187_v19 = vshll.u32 %v6575_v15, 16  ;;  %v2191_v20 = vshrl.u32 %v6575_v15, 16  ;;  %v5245_v21 = vld [vmem:[%s6549_s27 + $0x18] sm:$0xf] }
  0x15   : > { %5763 = vmatprep.mubr.msk.bf16.mxu1 %vm313_vm1, %v6390_v11  ;;  %5792 = vmatpush3.bf16.msra.mxu1 %v1099_v10  ;;  %v6391_v23 = vld [vmem:[%s6549_s27 + $0x24] sm:$0xff]   ;;  %v2197_v24 = vshll.u32 %v6578_v16, 16  ;;  %v6592_v25 = vld [vmem:[%s6549_s27 + $0x1c] sm:$0xf]  ;;  %v2202_v26 = vshrl.u32 %v5245_v21, 16  ;;  %v2205_v35 = vshll.u32 %v5245_v21, 16 }
  0x16   : > { %6355 = vmatprep.subr.msk.bf16.mxu1 %vm362_vm0, %v5144_v8  ;;  %v2180_v28 = vrot.slane %v2178_v17, 4  ;;  %v2183_v29 = vrot.slane %v2181_v18, 5  ;;  %v2189_v30 = vrot.slane %v2187_v19, 5  ;;  %v2193_v31 = vrot.slane %v2191_v20, 4  ;;  %v6598_v32 = vld [vmem:[%s6549_s27 + $0x20] sm:$0x1] }
  0x17   : > { %v2199_v33 = vrot.slane %v2197_v24, 5  ;;  %v2204_v34 = vrot.slane %v2202_v26, 4  ;;  %v2211_v36 = vshll.u32 %v6592_v25, 16  ;;  %v2215_v39 = vshrl.u32 %v6592_v25, 16  ;;  %v6392_v41 = vld [vmem:[%s6549_s27 + $0x30] sm:$0xff]   ;;  %v6393_v0 = vld [vmem:[%s6549_s27 + $0x3c] sm:$0xff]  }
  0x18   : > { %v2184_v37 = vor.u32 %v2183_v29, %v2180_v28  ;;  %v2194_v38 = vor.u32 %v2193_v31, %v2189_v30  ;;  %v2221_v40 = vshll.u32 %v6598_v32, 16  ;;  %v2921_v43 = vrot.slane %v6575_v15, 5  ;;  %v5248_v54 = vld [vmem:[%s6549_s27 + $0x24] sm:$0xf]  ;;  %v6621_v55 = vld [vmem:[%s6549_s27 + $0x28] sm:$0xf] }
  0x19   : > { %v2207_v44 = vrot.slane %v2205_v35, 5  ;;  %v2213_v45 = vrot.slane %v2211_v36, 5  ;;  %v2924_v49 = vrot.slane %v6578_v16, 5  ;;  %v2217_v50 = vrot.slane %v2215_v39, 4  ;;  %v6628_v59 = vld [vmem:[%s6549_s27 + $0x2c] sm:$0x1] }
  0x1a   : > { %v2185_v47 = vrot.slane %v2184_v37, 4  ;;  %v2195_v48 = vrot.slane %v2194_v38, 4  ;;  %v2223_v52 = vrot.slane %v2221_v40, 5  ;;  %v2928_v53 = vrot.slane %v6592_v25, 5  ;;  %v5251_v61 = vld [vmem:[%s6549_s27 + $0x30] sm:$0xf] }
  0x1b   : > { %v2208_v51 = vor.u32 %v2207_v44, %v2204_v34  ;;  %v2218_v58 = vor.u32 %v2217_v50, %v2213_v45  ;;  %v2226_v60 = vshrl.u32 %v5248_v54, 16  ;;  %v2229_v1 = vshll.u32 %v5248_v54, 16  ;;  %v6634_v3 = vld [vmem:[%s6549_s27 + $0x34] sm:$0xf]  ;;  %v6639_v10 = vld [vmem:[%s6549_s27 + $0x38] sm:$0x1] }
  0x1c   : > { %5764 = vmatmul.mubr.msk.bf16.gmra.mrb[4].mxu1 %vm313_vm1, %v6391_v23  ;;  %v2190_v56 = vsel %vm6606_vm4, %v2185_v47, %v2189_v30  ;;  %v2200_v57 = vsel %vm6606_vm4, %v2195_v48, %v2199_v33  ;;  %v2235_v2 = vshll.u32 %v6621_v55, 16  ;;  %v2239_v8 = vshrl.u32 %v6621_v55, 16  ;;  %v6394_v19 = vld [vmem:[%s6549_s27 + $0x48] sm:$0xff]   ;;  %v5254_v36 = vld [vmem:[%s6549_s27 + $0x3c] sm:$0xf] }
  0x1d   : > { %5767 = vmatprep.mubr.msk.bf16.mxu1 %vm313_vm1, %v6392_v41  ;;  %v5291_v62 = vcombine.low %v2190_v56, %v2200_v57  ;;  %v2209_v63 = vrot.slane %v2208_v51, 4  ;;  %v2219_v5 = vrot.slane %v2218_v58, 4  ;;  %v2228_v7 = vrot.slane %v2226_v60, 4  ;;  %v6660_v41 = vld [vmem:[%s6549_s27 + $0x40] sm:$0xf] }
  0x1e   : > { %v2245_v9 = vshll.u32 %v6628_v59, 16  ;;  %v2231_v14 = vrot.slane %v2229_v1, 5  ;;  %v2237_v17 = vrot.slane %v2235_v2, 5  ;;  %v2250_v18 = vshrl.u32 %v5251_v61, 16  ;;  %v6664_v50 = vld [vmem:[%s6549_s27 + $0x44] sm:$0x1] }
  0x1f   : > { %5895 = vmatprep.mubr.msk.bf16.mxu0 %vm313_vm1, %v5291_v62  ;;  %v2214_v11 = vsel %vm6606_vm4, %v2209_v63, %v2213_v45  ;;  %v2224_v20 = vsel %vm6606_vm4, %v2219_v5, %v2223_v52  ;;  %v2241_v21 = vrot.slane %v2239_v8, 4  ;;  %v2253_v24 = vshll.u32 %v5251_v61, 16  ;;  %v6395_v52 = vld [vmem:[%s6549_s27 + $0x54] sm:$0xff]   ;;  %v5257_v58 = vld [vmem:[%s6549_s27 + $0x48] sm:$0xf]  ;;  %v6396_v8 = vld [vmem:[%s6549_s27 + $0x60] sm:$0xff]  }
  0x20   : > { %v2247_v23 = vrot.slane %v2245_v9, 5  ;;  %v5292_v26 = vcombine.low %v2214_v11, %v2224_v20  ;;  %v2232_v28 = vor.u32 %v2231_v14, %v2228_v7  ;;  %v2252_v29 = vrot.slane %v2250_v18, 4  ;;  %v6677_v63 = vld [vmem:[%s6549_s27 + $0x4c] sm:$0xf]  ;;  %v6680_v7 = vld [vmem:[%s6549_s27 + $0x50] sm:$0x1] }
  0x21   : > { %v2259_v30 = vshll.u32 %v6634_v3, 16  ;;  %v2242_v31 = vor.u32 %v2241_v21, %v2237_v17  ;;  %v2255_v33 = vrot.slane %v2253_v24, 5  ;;  %v2263_v34 = vshrl.u32 %v6634_v3, 16 }
  0x22   : > { %v2269_v35 = vshll.u32 %v6639_v10, 16  ;;  %5896 = vmatmul.mubr.msk.bf16.vlgmr.msra.gmra.mrb[0].mxu0 %vm313_vm1, %v5292_v26  ;;  %v6655_v37 = vrot.slane %v2928_v53, 4  ;;  %v2931_v38 = vrot.slane %v6598_v32, 5  ;;  %v2233_v39 = vrot.slane %v2232_v28, 4  ;;  %v5260_v28 = vld [vmem:[%s6549_s27 + $0x54] sm:$0xf] }
  0x23   : > { %v2261_v40 = vrot.slane %v2259_v30, 5  ;;  %5928 = vmatpush3.bf16.msra.mxu0 %v6566_v12  ;;  %v2243_v44 = vrot.slane %v2242_v31, 4  ;;  %v2256_v45 = vor.u32 %v2255_v33, %v2252_v29  ;;  %v2265_v47 = vrot.slane %v2263_v34, 4  ;;  %v6695_v34 = vld [vmem:[%s6549_s27 + $0x58] sm:$0xf] }
  0x24   : > { %5768 = vmatmul.mubr.msk.bf16.gmra.mrb[8].mxu1 %vm313_vm1, %v6393_v0  ;;  %v2271_v48 = vrot.slane %v2269_v35, 5  ;;  %v2238_v51 = vsel %vm6606_vm4, %v2233_v39, %v2237_v17  ;;  %v2274_v54 = vshrl.u32 %v5254_v36, 16  ;;  %v2277_v56 = vshll.u32 %v5254_v36, 16  ;;  %6360 = vmatprep.subr.msk.bf16.mxu0 %vm362_vm0, %v6554_v6 }
  0x25   : > { %5771 = vmatprep.mubr.msk.bf16.mxu1 %vm313_vm1, %v6394_v19  ;;  %v2283_v57 = vshll.u32 %v6660_v41, 16  ;;  %v2248_v12 = vsel %vm6606_vm4, %v2243_v44, %v2247_v23  ;;  %v2257_v60 = vrot.slane %v2256_v45, 4  ;;  %v2266_v61 = vor.u32 %v2265_v47, %v2261_v40  ;;  %v6397_v44 = vld [vmem:[%s6549_s27 + $0x6c] sm:$0xff]   ;;  %v6700_v45 = vld [vmem:[%s6549_s27 + $0x5c] sm:$0x1] }
  0x26   : > { %v2287_v62 = vshrl.u32 %v6660_v41, 16  ;;  %v5293_v0 = vcombine.low %v2238_v51, %v2248_v12  ;;  %v2276_v1 = vrot.slane %v2274_v54, 4  ;;  %v2279_v2 = vrot.slane %v2277_v56, 5  ;;  %v5263_v54 = vld [vmem:[%s6549_s27 + $0x60] sm:$0xf] }
  0x27   : > { %v2285_v5 = vrot.slane %v2283_v57, 5  ;;  %v2262_v9 = vsel %vm6606_vm4, %v2257_v60, %v2261_v40  ;;  %v2267_v6 = vrot.slane %v2266_v61, 4  ;;  %v2293_v14 = vshll.u32 %v6664_v50, 16  ;;  %v6707_v56 = vld [vmem:[%s6549_s27 + $0x64] sm:$0xf] }
  0x28   : > { %v2289_v11 = vrot.slane %v2287_v62, 4  ;;  %5899 = vmatprep.mubr.msk.bf16.mxu0 %vm313_vm1, %v5293_v0  ;;  %v2280_v17 = vor.u32 %v2279_v2, %v2276_v1  ;;  %v2298_v18 = vshrl.u32 %v5257_v58, 16  ;;  %v2301_v19 = vshll.u32 %v5257_v58, 16  ;;  %v6713_v2 = vld [vmem:[%s6549_s27 + $0x68] sm:$0x1] }
  0x29   : > { %v2307_v20 = vshll.u32 %v6677_v63, 16  ;;  %v2272_v21 = vsel %vm6606_vm4, %v2267_v6, %v2271_v48  ;;  %v2295_v24 = vrot.slane %v2293_v14, 5  ;;  %v2311_v26 = vshrl.u32 %v6677_v63, 16 }
  0x2a   : > { %v2290_v23 = vor.u32 %v2289_v11, %v2285_v5  ;;  %v5294_v29 = vcombine.low %v2262_v9, %v2272_v21  ;;  %v2281_v30 = vrot.slane %v2280_v17, 4  ;;  %v2300_v31 = vrot.slane %v2298_v18, 4  ;;  %v5324_v21 = vld [vmem:[%s6549_s27 + $0x18] sm:$0xe] }
  0x2b   : > { %v2303_v33 = vrot.slane %v2301_v19, 5  ;;  %v2309_v36 = vrot.slane %v2307_v20, 5  ;;  %v2313_v39 = vrot.slane %v2311_v26, 4  ;;  %v2317_v40 = vshll.u32 %v6680_v7, 16  ;;  %v5323_v20 = vld [vmem:[%s6549_s27 + $0xc] sm:$0xe] }
  0x2c   : > { %5772 = vmatmul.mubr.msk.bf16.gmra.mrb[12].mxu1 %vm313_vm1, %v6395_v52  ;;  %v2291_v35 = vrot.slane %v2290_v23, 4  ;;  %5900 = vmatmul.mubr.msk.bf16.gmra.mrb[4].mxu0 %vm313_vm1, %v5294_v29  ;;  %v2286_v47 = vsel %vm6606_vm4, %v2281_v30, %v2285_v5  ;;  %v2322_v51 = vshrl.u32 %v5260_v28, 16  ;;  %v2325_v52 = vshll.u32 %v5260_v28, 16  ;;  %v6398_v5 = vld [vmem:[%s6549_s27 + $0x78] sm:$0xff]  }
  0x2d   : > { %5775 = vmatprep.mubr.msk.bf16.mxu1 %vm313_vm1, %v6396_v8  ;;  %v2304_v48 = vor.u32 %v2303_v33, %v2300_v31  ;;  %v2314_v58 = vor.u32 %v2313_v39, %v2309_v36  ;;  %v2319_v12 = vrot.slane %v2317_v40, 5  ;;  %v2331_v60 = vshll.u32 %v6695_v34, 16 }
  0x2e   : > { %v2296_v57 = vsel %vm6606_vm4, %v2291_v35, %v2295_v24  ;;  %v2324_v0 = vrot.slane %v2322_v51, 4  ;;  %v2327_v1 = vrot.slane %v2325_v52, 5  ;;  %v2335_v6 = vshrl.u32 %v6695_v34, 16 }
  0x2f   : > { %v5295_v61 = vcombine.low %v2286_v47, %v2296_v57  ;;  %v2305_v62 = vrot.slane %v2304_v48, 4  ;;  %v2315_v8 = vrot.slane %v2314_v58, 4  ;;  %v2333_v9 = vrot.slane %v2331_v60, 5  ;;  %v6400_v57 = vld [vmem:[%s6549_s27 + $0x90] sm:$0xff]   ;;  %v5325_v58 = vld [vmem:[%s6549_s27 + $0x24] sm:$0xe] }
  0x30   : > { %v2341_v11 = vshll.u32 %v6700_v45, 16  ;;  %v2328_v17 = vor.u32 %v2327_v1, %v2324_v0  ;;  %v2346_v18 = vshrl.u32 %v5263_v54, 16  ;;  %v2349_v19 = vshll.u32 %v5263_v54, 16  ;;  %v5326_v0 = vld [vmem:[%s6549_s27 + $0x30] sm:$0xe] }
  0x31   : > { %5903 = vmatprep.mubr.msk.bf16.mxu0 %vm313_vm1, %v5295_v61  ;;  %v2310_v14 = vsel %vm6606_vm4, %v2305_v62, %v2309_v36  ;;  %v2320_v23 = vsel %vm6606_vm4, %v2315_v8, %v2319_v12  ;;  %v2337_v24 = vrot.slane %v2335_v6, 4  ;;  %v2355_v28 = vshll.u32 %v6707_v56, 16 }
  0x32   : > { %v2343_v26 = vrot.slane %v2341_v11, 5  ;;  %v5296_v29 = vcombine.low %v2310_v14, %v2320_v23  ;;  %v2329_v30 = vrot.slane %v2328_v17, 4  ;;  %v2348_v31 = vrot.slane %v2346_v18, 4  ;;  %v5327_v14 = vld [vmem:[%s6549_s27 + $0x3c] sm:$0xe] }
  0x33   : > { %v2351_v33 = vrot.slane %v2349_v19, 5  ;;  %v2338_v35 = vor.u32 %v2337_v24, %v2333_v9  ;;  %v2357_v36 = vrot.slane %v2355_v28, 5  ;;  %v2359_v39 = vshrl.u32 %v6707_v56, 16  ;;  %v565_v24 = vld [vmem:[%s6549_s27] sm:$0xf] }
  0x34   : > { %5776 = vmatmul.mubr.msk.bf16.gmra.mrb[16].mxu1 %vm313_vm1, %v6397_v44  ;;  %v2365_v40 = vshll.u32 %v6713_v2, 16  ;;  %v6399_v44 = vld [vmem:[%s6549_s27 + $0x84] sm:$0xff]   ;;  %5904 = vmatmul.mubr.msk.bf16.gmra.mrb[8].mxu0 %vm313_vm1, %v5296_v29  ;;  %v2334_v48 = vsel %vm6606_vm4, %v2329_v30, %v2333_v9  ;;  %v5339_v52 = vrot.slane %v5323_v20, 9  ;;  %v2923_v54 = vrot.slane %v2921_v43, 4 }
  0x35   : > { %5779 = vmatprep.mubr.msk.bf16.mxu1 %vm313_vm1, %v6398_v5  ;;  %v2352_v51 = vor.u32 %v2351_v33, %v2348_v31  ;;  %v2339_v12 = vrot.slane %v2338_v35, 4  ;;  %v2361_v60 = vrot.slane %v2359_v39, 4  ;;  %v5340_v62 = vrot.slane %v5324_v21, 9  ;;  %v5328_v20 = vld [vmem:[%s6549_s27 + $0x48] sm:$0xe]  ;;  %v6401_v31 = vld [vmem:[%s6549_s27 + $0x9c] sm:$0xff]  }
  0x36   : > { %v2367_v61 = vrot.slane %v2365_v40, 5  ;;  %v6750_v5 = vsel %vm6733_vm7, %v6655_v37, %v2931_v38  ;;  %v5341_v8 = vrot.slane %v5325_v58, 9  ;;  %v2922_v11 = vsel %vm6733_vm7, %v5339_v52, %v2921_v43  ;;  %v566_v30 = vld [vmem:[%s6549_s27 + $0x4] sm:$0xf]  ;;  %v6402_v35 = vld [vmem:[%s6549_s27 + $0xa8] sm:$0xff]  }
  0x37   : > { %v2353_v1 = vrot.slane %v2352_v51, 4  ;;  %v2344_v9 = vsel %vm6606_vm4, %v2339_v12, %v2343_v26  ;;  %v2362_v6 = vor.u32 %v2361_v60, %v2357_v36  ;;  %v2925_v32 = vsel %vm6733_vm7, %v2923_v54, %v2924_v49  ;;  %v568_v52 = vld [vmem:[%s6549_s27 + $0xc] sm:$0xf]  ;;  %v6820_v60 = vld [vmem:[%s6549_s27 + $0x10] sm:$0xf] }
  0x38   : > { %v5297_v17 = vcombine.low %v2334_v48, %v2344_v9  ;;  %v6769_v38 = vsel %vm6733_vm7, %v5340_v62, %v2928_v53  ;;  %v2935_v15 = vrot.slane %v6621_v55, 5  ;;  %v2938_v16 = vrot.slane %v6628_v59, 5  ;;  %v6811_v48 = vld [vmem:[%s6549_s27 + $0x8] sm:$0x1] }
  0x39   : > { %v2358_v37 = vsel %vm6606_vm4, %v2353_v1, %v2357_v36  ;;  %v2363_v43 = vrot.slane %v2362_v6, 4  ;;  %v5342_v49 = vrot.slane %v5326_v0, 9  ;;  %v2942_v18 = vrot.slane %v6634_v3, 5 }
  0x3a   : > { %5907 = vmatprep.mubr.msk.bf16.mxu0 %vm313_vm1, %v5297_v17  ;;  %v5356_v19 = vcombine.low %v2922_v11, %v2925_v32  ;;  %v2937_v25 = vrot.slane %v2935_v15, 4  ;;  %v2945_v53 = vrot.slane %v6639_v10, 5  ;;  %v5343_v55 = vrot.slane %v5327_v14, 9  ;;  %v6831_v11 = vld [vmem:[%s6549_s27 + $0x14] sm:$0x1] }
  0x3b   : > { %v2368_v21 = vsel %vm6606_vm4, %v2363_v43, %v2367_v61  ;;  %v6783_v59 = vsel %vm6733_vm7, %v5341_v8, %v2935_v15  ;;  %v2944_v3 = vrot.slane %v2942_v18, 4  ;;  %v2949_v23 = vrot.slane %v6660_v41, 5  ;;  %v5329_v43 = vld [vmem:[%s6549_s27 + $0x54] sm:$0xe] }
  0x3c   : > { %5780 = vmatmul.mubr.msk.bf16.gmra.mrb[20].mxu1 %vm313_vm1, %v6399_v44  ;;  %v5298_v26 = vcombine.low %v2358_v37, %v2368_v21  ;;  %v5357_v28 = vcombine.low %v6769_v38, %v6750_v5  ;;  %v2939_v10 = vsel %vm6733_vm7, %v2937_v25, %v2938_v16  ;;  %v2952_v29 = vrot.slane %v6664_v50, 5  ;;  %v6403_v25 = vld [vmem:[%s6549_s27 + $0xb4] sm:$0xff]  }
  0x3d   : > { %5783 = vmatprep.mubr.msk.bf16.mxu1 %vm313_vm1, %v6400_v57  ;;  %v6796_v33 = vsel %vm6733_vm7, %v5342_v49, %v2942_v18  ;;  %v6800_v41 = vsel %vm6733_vm7, %v2944_v3, %v2945_v53  ;;  %v2951_v36 = vrot.slane %v2949_v23, 4  ;;  %v5344_v39 = vrot.slane %v5328_v20, 9 }
  0x3e   : > { %5908 = vmatmul.mubr.msk.bf16.gmra.mrb[12].mxu0 %vm313_vm1, %v5298_v26  ;;  %v5358_v40 = vcombine.low %v6783_v59, %v2939_v10  ;;  %v6807_v50 = vsel %vm6733_vm7, %v5343_v55, %v2949_v23  ;;  %v2956_v44 = vrot.slane %v6677_v63, 5  ;;  %v617_v51 = vshrl.u32 %v565_v24, 16  ;;  %v5330_v59 = vld [vmem:[%s6549_s27 + $0x60] sm:$0xe]  ;;  %v571_v10 = vld [vmem:[%s6549_s27 + $0x18] sm:$0xf] }
  0x3f   : > { %5929 = vmatprep.mubr.msk.bf16.mxu0 %vm313_vm1, %v5356_v19  ;;  %v6817_v54 = vsel %vm6733_vm7, %v2951_v36, %v2952_v29  ;;  %v620_v57 = vshll.u32 %v565_v24, 16  ;;  %v626_v58 = vshll.u32 %v566_v30, 16  ;;  %v630_v12 = vshrl.u32 %v566_v30, 16 }
  0x40   : > { %v5359_v61 = vcombine.low %v6796_v33, %v6800_v41  ;;  %v2958_v63 = vrot.slane %v2956_v44, 4  ;;  %v2959_v62 = vrot.slane %v6680_v7, 5  ;;  %v619_v0 = vrot.slane %v617_v51, 4  ;;  %v5267_v41 = vld [vmem:[%s6549_s27 + $0x70] sm:$0xf] }
  0x41   : > { %v622_v1 = vrot.slane %v620_v57, 5  ;;  %v628_v5 = vrot.slane %v626_v58, 5  ;;  %v632_v8 = vrot.slane %v630_v12, 4  ;;  %v636_v9 = vshll.u32 %v6811_v48, 16  ;;  %v6870_v58 = vld [vmem:[%s6549_s27 + $0x20] sm:$0x1] }
  0x42   : > { %v5360_v6 = vcombine.low %v6807_v50, %v6817_v54  ;;  %v641_v32 = vshrl.u32 %v568_v52, 16  ;;  %v644_v14 = vshll.u32 %v568_v52, 16  ;;  %v650_v7 = vshll.u32 %v6820_v60, 16 }
  0x43   : > { %v6836_v17 = vsel %vm6733_vm7, %v5344_v39, %v2956_v44  ;;  %v623_v37 = vor.u32 %v622_v1, %v619_v0  ;;  %v633_v38 = vor.u32 %v632_v8, %v628_v5  ;;  %v638_v15 = vrot.slane %v636_v9, 5  ;;  %v574_v1 = vld [vmem:[%s6549_s27 + $0x24] sm:$0xf] }
  0x44   : > { %5784 = vmatmul.mubr.msk.bf16.gmra.mrb[24].mxu1 %vm313_vm1, %v6401_v31  ;;  %v643_v16 = vrot.slane %v641_v32, 4  ;;  %v646_v49 = vrot.slane %v644_v14, 5  ;;  %v652_v18 = vrot.slane %v650_v7, 5  ;;  %v654_v19 = vshrl.u32 %v6820_v60, 16  ;;  %v6890_v14 = vld [vmem:[%s6549_s27 + $0x28] sm:$0xf] }
  0x45   : > { %5787 = vmatprep.mubr.msk.bf16.mxu1 %vm313_vm1, %v6402_v35  ;;  %v6843_v53 = vsel %vm6733_vm7, %v2958_v63, %v2959_v62  ;;  %v624_v55 = vrot.slane %v623_v37, 4  ;;  %v634_v20 = vrot.slane %v633_v38, 4  ;;  %v660_v21 = vshll.u32 %v6831_v11, 16  ;;  %v6858_v35 = vld [vmem:[%s6549_s27 + $0x1c] sm:$0xf] }
  0x46   : > { %5930 = vmatmul.mubr.msk.bf16.vlgmr.msra.gmra.mrb[0].mxu0 %vm313_vm1, %v5357_v28  ;;  %v647_v3 = vor.u32 %v646_v49, %v643_v16  ;;  %v656_v23 = vrot.slane %v654_v19, 4  ;;  %v5345_v24 = vrot.slane %v5329_v43, 9  ;;  %v2963_v26 = vrot.slane %v6695_v34, 5  ;;  %v5331_v19 = vld [vmem:[%s6549_s27 + $0x6c] sm:$0xe] }
  0x47   : > { %5962 = vmatpush3.bf16.msra.mxu0 %v6570_v13  ;;  %5933 = vmatprep.mubr.msk.bf16.mxu0 %vm313_vm1, %v5358_v40  ;;  %v629_v29 = vsel %vm6606_vm4, %v624_v55, %v628_v5  ;;  %v639_v30 = vsel %vm6606_vm4, %v634_v20, %v638_v15  ;;  %v662_v31 = vrot.slane %v660_v21, 5  ;;  %v2966_v28 = vrot.slane %v6700_v45, 5  ;;  %v6895_v15 = vld [vmem:[%s6549_s27 + $0x2c] sm:$0x1] }
  0x48   : > { %v5096_v36 = vcombine.low %v629_v29, %v639_v30  ;;  %v648_v39 = vrot.slane %v647_v3, 4  ;;  %v657_v34 = vor.u32 %v656_v23, %v652_v18  ;;  %v5346_v44 = vrot.slane %v5330_v59, 9  ;;  %6361 = vmatprep.subr.msk.bf16.mxu0 %vm362_vm0, %v6587_v22  ;;  %v5268_v23 = vld [vmem:[%s6549_s27 + $0x74] sm:$0x1] }
  0x49   : > { %v5361_v13 = vcombine.low %v6836_v17, %v6843_v53  ;;  %v2965_v40 = vrot.slane %v2963_v26, 4  ;;  %v2970_v51 = vrot.slane %v6707_v56, 5  ;;  %v665_v52 = vshrl.u32 %v571_v10, 16 }
  0x4a   : > { %v653_v45 = vsel %vm6606_vm4, %v648_v39, %v652_v18  ;;  %v658_v57 = vrot.slane %v657_v34, 4  ;;  %v668_v22 = vshll.u32 %v571_v10, 16  ;;  %v674_v12 = vshll.u32 %v6858_v35, 16 }
  0x4b   : > { %v6875_v63 = vsel %vm6733_vm7, %v5345_v24, %v2963_v26  ;;  %v6879_v56 = vsel %vm6733_vm7, %v2965_v40, %v2966_v28  ;;  %v2973_v62 = vrot.slane %v6713_v2, 5  ;;  %v667_v0 = vrot.slane %v665_v52, 4 }
  0x4c   : > { %5788 = vmatmul.mubr.msk.bf16.gmra.mrb[28].mxu1 %vm313_vm1, %v6403_v25  ;;  %v663_v5 = vsel %vm6606_vm4, %v658_v57, %v662_v31  ;;  %v6887_v8 = vsel %vm6733_vm7, %v5346_v44, %v2970_v51  ;;  %v2972_v9 = vrot.slane %v2970_v51, 4  ;;  %v670_v32 = vrot.slane %v668_v22, 5  ;;  %v5270_v31 = vld [vmem:[%s6549_s27 + $0x7c] sm:$0xf] }
  0x4d   : > { %5793 = vmatprep.mubr.msk.bf16.mxu1 %vm313_vm1, %v5096_v36  ;;  %v5097_v7 = vcombine.low %v653_v45, %v663_v5  ;;  %v676_v37 = vrot.slane %v674_v12, 5  ;;  %v678_v38 = vshrl.u32 %v6858_v35, 16  ;;  %v684_v2 = vshll.u32 %v6870_v58, 16  ;;  %v5332_v45 = vld [vmem:[%s6549_s27 + $0x78] sm:$0xe] }
  0x4e   : > { %5934 = vmatmul.mubr.msk.bf16.gmra.mrb[4].mxu0 %vm313_vm1, %v5359_v61  ;;  %v5362_v43 = vcombine.low %v6875_v63, %v6879_v56  ;;  %v671_v16 = vor.u32 %v670_v32, %v667_v0  ;;  %v689_v49 = vshrl.u32 %v574_v1, 16  ;;  %v692_v18 = vshll.u32 %v574_v1, 16  ;;  %v6926_v12 = vld [vmem:[%s6549_s27 + $0x80] sm:$0x1]  ;;  %v577_v5 = vld [vmem:[%s6549_s27 + $0x30] sm:$0xf] }
  0x4f   : > { %5937 = vmatprep.mubr.msk.bf16.mxu0 %vm313_vm1, %v5360_v6  ;;  %v680_v25 = vrot.slane %v678_v38, 4  ;;  %v686_v55 = vrot.slane %v684_v2, 5  ;;  %v698_v20 = vshll.u32 %v6890_v14, 16  ;;  %v702_v33 = vshrl.u32 %v6890_v14, 16 }
  0x50   : > { %v672_v61 = vrot.slane %v671_v16, 4  ;;  %v691_v21 = vrot.slane %v689_v49, 4  ;;  %v694_v59 = vrot.slane %v692_v18, 5  ;;  %v708_v3 = vshll.u32 %v6895_v15, 16 }
  0x51   : > { %v681_v24 = vor.u32 %v680_v25, %v676_v37  ;;  %v700_v50 = vrot.slane %v698_v20, 5  ;;  %v704_v54 = vrot.slane %v702_v33, 4  ;;  %v5347_v6 = vrot.slane %v5331_v19, 9  ;;  %v580_v19 = vld [vmem:[%s6549_s27 + $0x3c] sm:$0xf] }
  0x52   : > { %v677_v26 = vsel %vm6606_vm4, %v672_v61, %v676_v37  ;;  %v695_v10 = vor.u32 %v694_v59, %v691_v21  ;;  %v710_v29 = vrot.slane %v708_v3, 5  ;;  %v2977_v30 = vrot.slane %v5267_v41, 5  ;;  %v6966_v41 = vld [vmem:[%s6549_s27 + $0x40] sm:$0xf] }
  0x53   : > { %v682_v28 = vrot.slane %v681_v24, 4  ;;  %v705_v36 = vor.u32 %v704_v54, %v700_v50  ;;  %v2980_v39 = vrot.slane %v5268_v23, 5  ;;  %v2403_v34 = vshll.u32 %v5270_v31, 16  ;;  %v6969_v23 = vld [vmem:[%s6549_s27 + $0x44] sm:$0x1] }
  0x54   : > { %5794 = vmatmul.mubr.msk.bf16.vlgmr.msra.gmra.mrb[0].mxu1 %vm313_vm1, %v5097_v7  ;;  %v2974_v44 = vsel %vm6733_vm7, %v2972_v9, %v2973_v62  ;;  %v696_v40 = vrot.slane %v695_v10, 4  ;;  %v2979_v51 = vrot.slane %v2977_v30, 4  ;;  %v2407_v52 = vshrl.u32 %v5270_v31, 16  ;;  %v6942_v9 = vld [vmem:[%s6549_s27 + $0x34] sm:$0xf] }
  0x55   : > { %5826 = vmatpush3.bf16.msra.mxu1 %v6595_v27  ;;  %v687_v27 = vsel %vm6606_vm4, %v682_v28, %v686_v55  ;;  %v706_v57 = vrot.slane %v705_v36, 4  ;;  %v2978_v22 = vsel %vm6733_vm7, %v5347_v6, %v2977_v30  ;;  %v6928_v63 = vrot.slane %v2403_v34, 5  ;;  %v6950_v7 = vld [vmem:[%s6549_s27 + $0x38] sm:$0x1]  ;;  %v5273_v28 = vld [vmem:[%s6549_s27 + $0x88] sm:$0xf] }
  0x56   : > { %5938 = vmatmul.mubr.msk.bf16.gmra.mrb[8].mxu0 %vm313_vm1, %v5361_v13  ;;  %v5098_v56 = vcombine.low %v677_v26, %v687_v27  ;;  %v701_v62 = vsel %vm6606_vm4, %v696_v40, %v700_v50  ;;  %v2981_v0 = vsel %vm6733_vm7, %v2979_v51, %v2980_v39  ;;  %v6938_v1 = vrot.slane %v2407_v52, 4  ;;  %v5333_v26 = vld [vmem:[%s6549_s27 + $0x84] sm:$0xe]  ;;  %v5274_v36 = vld [vmem:[%s6549_s27 + $0x8c] sm:$0x1] }
  0x57   : > { %5941 = vmatprep.mubr.msk.bf16.mxu0 %vm313_vm1, %v5362_v43  ;;  %v5363_v32 = vcombine.low %v6887_v8, %v2974_v44  ;;  %v711_v17 = vsel %vm6606_vm4, %v706_v57, %v710_v29  ;;  %v5348_v13 = vrot.slane %v5332_v45, 9  ;;  %v5364_v38 = vcombine.low %v2978_v22, %v2981_v0  ;;  %v5276_v51 = vld [vmem:[%s6549_s27 + $0x94] sm:$0xf]  ;;  %v5334_v52 = vld [vmem:[%s6549_s27 + $0x90] sm:$0xe] }
  0x58   : > { %5797 = vmatprep.mubr.msk.bf16.mxu1 %vm313_vm1, %v5098_v56  ;;  %v5099_v37 = vcombine.low %v701_v62, %v711_v17  ;;  %v2984_v2 = vrot.slane %v5270_v31, 5  ;;  %v2987_v16 = vrot.slane %v6926_v12, 5  ;;  %v713_v43 = vshrl.u32 %v577_v5, 16  ;;  %v5277_v56 = vld [vmem:[%s6549_s27 + $0x98] sm:$0x1] }
  0x59   : > { %v716_v49 = vshll.u32 %v577_v5, 16  ;;  %v722_v8 = vshll.u32 %v6942_v9, 16  ;;  %v726_v18 = vshrl.u32 %v6942_v9, 16  ;;  %v732_v33 = vshll.u32 %v6950_v7, 16  ;;  %v583_v17 = vld [vmem:[%s6549_s27 + $0x48] sm:$0xf] }
  0x5a   : > { %v6962_v55 = vsel %vm6733_vm7, %v5348_v13, %v2984_v2  ;;  %v2986_v20 = vrot.slane %v2984_v2, 4  ;;  %v715_v61 = vrot.slane %v713_v43, 4  ;;  %v737_v54 = vshrl.u32 %v580_v19, 16 }
  0x5b   : > { %v718_v21 = vrot.slane %v716_v49, 5  ;;  %v724_v59 = vrot.slane %v722_v8, 5  ;;  %v728_v3 = vrot.slane %v726_v18, 4  ;;  %v734_v50 = vrot.slane %v732_v33, 5 }
  0x5c   : > { %5798 = vmatmul.mubr.msk.bf16.gmra.mrb[4].mxu1 %vm313_vm1, %v5099_v37  ;;  %v2988_v24 = vsel %vm6733_vm7, %v2986_v20, %v2987_v16  ;;  %v740_v6 = vshll.u32 %v580_v19, 16  ;;  %v746_v31 = vshll.u32 %v6966_v41, 16  ;;  %v739_v39 = vrot.slane %v737_v54, 4  ;;  %v6991_v16 = vld [vmem:[%s6549_s27 + $0x4c] sm:$0xf] }
  0x5d   : > { %v5365_v10 = vcombine.low %v6962_v55, %v2988_v24  ;;  %v719_v29 = vor.u32 %v718_v21, %v715_v61  ;;  %v729_v30 = vor.u32 %v728_v3, %v724_v59  ;;  %v750_v44 = vshrl.u32 %v6966_v41, 16  ;;  %v6996_v19 = vld [vmem:[%s6549_s27 + $0x50] sm:$0x1]  ;;  %v586_v21 = vld [vmem:[%s6549_s27 + $0x54] sm:$0xf] }
  0x5e   : > { %5942 = vmatmul.mubr.msk.bf16.gmra.mrb[12].mxu0 %vm313_vm1, %v5363_v32  ;;  %v742_v34 = vrot.slane %v740_v6, 5  ;;  %v756_v40 = vshll.u32 %v6969_v23, 16  ;;  %v748_v57 = vrot.slane %v746_v31, 5  ;;  %v5349_v22 = vrot.slane %v5333_v26, 9 }
  0x5f   : > { %5945 = vmatprep.mubr.msk.bf16.mxu0 %vm313_vm1, %v5364_v38  ;;  %v720_v45 = vrot.slane %v719_v29, 4  ;;  %v730_v27 = vrot.slane %v729_v30, 4  ;;  %v752_v0 = vrot.slane %v750_v44, 4  ;;  %v2991_v32 = vrot.slane %v5273_v28, 5 }
  0x60   : > { %v743_v62 = vor.u32 %v742_v34, %v739_v39  ;;  %v758_v5 = vrot.slane %v756_v40, 5  ;;  %v2994_v2 = vrot.slane %v5274_v36, 5  ;;  %v5350_v38 = vrot.slane %v5334_v52, 9  ;;  %v7011_v39 = vld [vmem:[%s6549_s27 + $0x58] sm:$0xf] }
  0x61   : > { %v725_v13 = vsel %vm6606_vm4, %v720_v45, %v724_v59  ;;  %v735_v37 = vsel %vm6606_vm4, %v730_v27, %v734_v50  ;;  %v753_v8 = vor.u32 %v752_v0, %v748_v57  ;;  %v2992_v18 = vsel %vm6733_vm7, %v5349_v22, %v2991_v32  ;;  %v5279_v52 = vld [vmem:[%s6549_s27 + $0xa0] sm:$0xf] }
  0x62   : > { %v5100_v43 = vcombine.low %v725_v13, %v735_v37  ;;  %v744_v49 = vrot.slane %v743_v62, 4  ;;  %v2993_v55 = vrot.slane %v2991_v32, 4  ;;  %v2998_v20 = vrot.slane %v5276_v51, 5  ;;  %v5335_v62 = vld [vmem:[%s6549_s27 + $0x9c] sm:$0xe] }
  0x63   : > { %v3001_v33 = vrot.slane %v5277_v56, 5  ;;  %v761_v61 = vshrl.u32 %v583_v17, 16  ;;  %v754_v3 = vrot.slane %v753_v8, 4  ;;  %v764_v24 = vshll.u32 %v583_v17, 16  ;;  %v5280_v56 = vld [vmem:[%s6549_s27 + $0xa4] sm:$0x1] }
  0x64   : > { %5801 = vmatprep.mubr.msk.bf16.mxu1 %vm313_vm1, %v5100_v43  ;;  %v749_v59 = vsel %vm6606_vm4, %v744_v49, %v748_v57  ;;  %v770_v50 = vshll.u32 %v6991_v16, 16  ;;  %v2995_v54 = vsel %vm6733_vm7, %v2993_v55, %v2994_v2  ;;  %v2999_v6 = vsel %vm6733_vm7, %v5350_v38, %v2998_v20  ;;  %v5282_v13 = vld [vmem:[%s6549_s27 + $0xac] sm:$0xf]  ;;  %v5336_v37 = vld [vmem:[%s6549_s27 + $0xa8] sm:$0xe] }
  0x65   : > { %v3000_v26 = vrot.slane %v2998_v20, 4  ;;  %v763_v29 = vrot.slane %v761_v61, 4  ;;  %v759_v30 = vsel %vm6606_vm4, %v754_v3, %v758_v5  ;;  %v5366_v31 = vcombine.low %v2992_v18, %v2995_v54  ;;  %v5283_v8 = vld [vmem:[%s6549_s27 + $0xb0] sm:$0x1]  ;;  %v589_v18 = vld [vmem:[%s6549_s27 + $0x60] sm:$0xf] }
  0x66   : > { %5946 = vmatmul.mubr.msk.bf16.gmra.mrb[16].mxu0 %vm313_vm1, %v5365_v10  ;;  %v766_v28 = vrot.slane %v764_v24, 5  ;;  %v772_v36 = vrot.slane %v770_v50, 5  ;;  %v5101_v34 = vcombine.low %v749_v59, %v759_v30  ;;  %v774_v40 = vshrl.u32 %v6991_v16, 16  ;;  %v7018_v10 = vld [vmem:[%s6549_s27 + $0x5c] sm:$0x1] }
  0x67   : > { %v3002_v44 = vsel %vm6733_vm7, %v3000_v26, %v3001_v33  ;;  %v780_v51 = vshll.u32 %v6996_v19, 16  ;;  %5949 = vmatprep.mubr.msk.bf16.mxu0 %vm313_vm1, %v5366_v31  ;;  %v785_v57 = vshrl.u32 %v586_v21, 16  ;;  %v788_v22 = vshll.u32 %v586_v21, 16 }
  0x68   : > { %v5367_v45 = vcombine.low %v2999_v6, %v3002_v44  ;;  %v767_v27 = vor.u32 %v766_v28, %v763_v29  ;;  %5802 = vmatmul.mubr.msk.bf16.gmra.mrb[8].mxu1 %vm313_vm1, %v5101_v34  ;;  %v776_v0 = vrot.slane %v774_v40, 4  ;;  %v794_v32 = vshll.u32 %v7011_v39, 16  ;;  %v7040_v40 = vld [vmem:[%s6549_s27 + $0x64] sm:$0xf] }
  0x69   : > { %v782_v5 = vrot.slane %v780_v51, 5  ;;  %v798_v17 = vshrl.u32 %v7011_v39, 16  ;;  %v787_v38 = vrot.slane %v785_v57, 4  ;;  %v790_v43 = vrot.slane %v788_v22, 5  ;;  %v7049_v22 = vld [vmem:[%s6549_s27 + $0x68] sm:$0x1] }
  0x6a   : > { %v768_v2 = vrot.slane %v767_v27, 4  ;;  %v804_v49 = vshll.u32 %v7018_v10, 16  ;;  %v777_v55 = vor.u32 %v776_v0, %v772_v36  ;;  %v796_v20 = vrot.slane %v794_v32, 5 }
  0x6b   : > { %v800_v33 = vrot.slane %v798_v17, 4  ;;  %v5351_v61 = vrot.slane %v5335_v62, 9  ;;  %v791_v59 = vor.u32 %v790_v43, %v787_v38  ;;  %v3005_v24 = vrot.slane %v5279_v52, 5  ;;  %v7053_v62 = vld [vmem:[%s6549_s27 + $0x70] sm:$0xf] }
  0x6c   : > { %v773_v21 = vsel %vm6606_vm4, %v768_v2, %v772_v36  ;;  %v806_v3 = vrot.slane %v804_v49, 5  ;;  %v778_v50 = vrot.slane %v777_v55, 4  ;;  %v3008_v6 = vrot.slane %v5280_v56, 5  ;;  %v592_v56 = vld [vmem:[%s6549_s27 + $0x6c] sm:$0xf] }
  0x6d   : > { %v801_v54 = vor.u32 %v800_v33, %v796_v20  ;;  %v5352_v26 = vrot.slane %v5336_v37, 9  ;;  %v792_v29 = vrot.slane %v791_v59, 4  ;;  %v3006_v30 = vsel %vm6733_vm7, %v5351_v61, %v3005_v24  ;;  %v5285_v49 = vld [vmem:[%s6549_s27 + $0xb8] sm:$0xf] }
  0x6e   : > { %5950 = vmatmul.mubr.msk.bf16.gmra.mrb[20].mxu0 %vm313_vm1, %v5367_v45  ;;  %v3007_v31 = vrot.slane %v3005_v24, 4  ;;  %v3012_v28 = vrot.slane %v5282_v13, 5  ;;  %v783_v36 = vsel %vm6606_vm4, %v778_v50, %v782_v5  ;;  %v3015_v44 = vrot.slane %v5283_v8, 5  ;;  %v7058_v13 = vld [vmem:[%s6549_s27 + $0x74] sm:$0x1] }
  0x6f   : > { %v802_v34 = vrot.slane %v801_v54, 4  ;;  %v809_v51 = vshrl.u32 %v589_v18, 16  ;;  %v5102_v52 = vcombine.low %v773_v21, %v783_v36  ;;  %v797_v45 = vsel %vm6606_vm4, %v792_v29, %v796_v20  ;;  %v5337_v24 = vld [vmem:[%s6549_s27 + $0xb4] sm:$0xe]  ;;  %v5338_v29 = vld [vmem:[%s6549_s27 + $0xc0] sm:$0xe] }
  0x70   : > { %v3009_v27 = vsel %vm6733_vm7, %v3007_v31, %v3008_v6  ;;  %v3013_v57 = vsel %vm6733_vm7, %v5352_v26, %v3012_v28  ;;  %v3014_v32 = vrot.slane %v3012_v28, 4  ;;  %v812_v2 = vshll.u32 %v589_v18, 16 }
  0x71   : > { %v807_v0 = vsel %vm6606_vm4, %v802_v34, %v806_v3  ;;  %v5368_v5 = vcombine.low %v3006_v30, %v3009_v27  ;;  %v811_v17 = vrot.slane %v809_v51, 4  ;;  %5805 = vmatprep.mubr.msk.bf16.mxu1 %vm313_vm1, %v5102_v52  ;;  %v818_v38 = vshll.u32 %v7040_v40, 16  ;;  %v5286_v3 = vld [vmem:[%s6549_s27 + $0xbc] sm:$0x1]  ;;  %v5288_v34 = vld [vmem:[%s6549_s27 + $0xc4] sm:$0xf] }
  0x72   : > { %v5103_v37 = vcombine.low %v797_v45, %v807_v0  ;;  %v822_v43 = vshrl.u32 %v7040_v40, 16  ;;  %v3016_v8 = vsel %vm6733_vm7, %v3014_v32, %v3015_v44  ;;  %v828_v55 = vshll.u32 %v7049_v22, 16  ;;  %v5289_v27 = vld [vmem:[%s6549_s27 + $0xc8] sm:$0x1] }
  0x73   : > { %5953 = vmatprep.mubr.msk.bf16.mxu0 %vm313_vm1, %v5368_v5  ;;  %v833_v20 = vshrl.u32 %v592_v56, 16  ;;  %v836_v33 = vshll.u32 %v592_v56, 16  ;;  %v5369_v61 = vcombine.low %v3013_v57, %v3016_v8  ;;  %v814_v18 = vrot.slane %v812_v2, 5  ;;  %v595_v57 = vld [vmem:[%s6549_s27 + $0x78] sm:$0xf] }
  0x74   : > { %5806 = vmatmul.mubr.msk.bf16.gmra.mrb[12].mxu1 %vm313_vm1, %v5103_v37  ;;  %v820_v21 = vrot.slane %v818_v38, 5  ;;  %v824_v59 = vrot.slane %v822_v43, 4  ;;  %v830_v50 = vrot.slane %v828_v55, 5  ;;  %v842_v26 = vshll.u32 %v7053_v62, 16  ;;  %v7084_v43 = vld [vmem:[%s8154_s1 + $0x6] sm:$0x3] }
  0x75   : > { %v835_v54 = vrot.slane %v833_v20, 4  ;;  %v838_v6 = vrot.slane %v836_v33, 5  ;;  %v815_v30 = vor.u32 %v814_v18, %v811_v17  ;;  %v846_v28 = vshrl.u32 %v7053_v62, 16  ;;  %v7091_v33 = vld [vmem:[%s6549_s27 + $0x7c] sm:$0xf]  ;;  %6356 = vmatprep.subr.msk.bf16.mxu1 %vm362_vm0, %v7084_v43 }
  0x76   : > { %5954 = vmatmul.mubr.msk.bf16.gmra.mrb[24].mxu0 %vm313_vm1, %v5369_v61  ;;  %v825_v31 = vor.u32 %v824_v59, %v820_v21  ;;  %v852_v36 = vshll.u32 %v7058_v13, 16  ;;  %v844_v51 = vrot.slane %v842_v26, 5  ;;  %v5353_v52 = vrot.slane %v5337_v24, 9  ;;  %v7094_v61 = vld [vmem:[%s6549_s27 + $0x80] sm:$0x1] }
  0x77   : > { %v839_v44 = vor.u32 %v838_v6, %v835_v54  ;;  %v3019_v45 = vrot.slane %v5285_v49, 5  ;;  %v816_v56 = vrot.slane %v815_v30, 4  ;;  %v848_v5 = vrot.slane %v846_v28, 4  ;;  %v598_v24 = vld [vmem:[%s6549_s27 + $0x84] sm:$0xf] }
  0x78   : > { %v826_v0 = vrot.slane %v825_v31, 4  ;;  %v854_v32 = vrot.slane %v852_v36, 5  ;;  %v3022_v38 = vrot.slane %v5286_v3, 5  ;;  %v5354_v20 = vrot.slane %v5338_v29, 9  ;;  %v7104_v29 = vld [vmem:[%s6549_s27 + $0x88] sm:$0xf] }
  0x79   : > { %v840_v37 = vrot.slane %v839_v44, 4  ;;  %v3020_v17 = vsel %vm6733_vm7, %v5353_v52, %v3019_v45  ;;  %v3021_v2 = vrot.slane %v3019_v45, 4  ;;  %v821_v49 = vsel %vm6606_vm4, %v816_v56, %v820_v21  ;;  %v7116_v45 = vld [vmem:[%s6549_s27 + $0x8c] sm:$0x1] }
  0x7a   : > { %v831_v8 = vsel %vm6606_vm4, %v826_v0, %v830_v50  ;;  %v849_v55 = vor.u32 %v848_v5, %v844_v51  ;;  %v3026_v3 = vrot.slane %v5288_v34, 5  ;;  %v3029_v6 = vrot.slane %v5289_v27, 5  ;;  %v6404_v27 = vld [vmem:[%s6549_s27 + $0x18] sm:$0xff]  }
  0x7b   : > { %v5104_v18 = vcombine.low %v821_v49, %v831_v8  ;;  %v845_v59 = vsel %vm6606_vm4, %v840_v37, %v844_v51  ;;  %v3023_v21 = vsel %vm6733_vm7, %v3021_v2, %v3022_v38  ;;  %v857_v26 = vshrl.u32 %v595_v57, 16  ;;  %v601_v37 = vld [vmem:[%s6549_s27 + $0x90] sm:$0xf]  ;;  %v7123_v49 = vld [vmem:[%s6549_s27 + $0x94] sm:$0xf] }
  0x7c   : > { %v850_v50 = vrot.slane %v849_v55, 4  ;;  %v5370_v54 = vcombine.low %v3020_v17, %v3023_v21  ;;  %v3027_v30 = vsel %vm6733_vm7, %v5354_v20, %v3026_v3  ;;  %v3028_v31 = vrot.slane %v3026_v3, 4 }
  0x7d   : > { %5809 = vmatprep.mubr.msk.bf16.mxu1 %vm313_vm1, %v5104_v18  ;;  %v860_v28 = vshll.u32 %v595_v57, 16  ;;  %v866_v36 = vshll.u32 %v7091_v33, 16  ;;  %v859_v44 = vrot.slane %v857_v26, 4  ;;  %v870_v51 = vshrl.u32 %v7091_v33, 16 }
  0x7e   : > { %v855_v34 = vsel %vm6606_vm4, %v850_v50, %v854_v32  ;;  %5957 = vmatprep.mubr.msk.bf16.mxu0 %vm313_vm1, %v5370_v54  ;;  %v876_v52 = vshll.u32 %v7094_v61, 16  ;;  %v3030_v57 = vsel %vm6733_vm7, %v3028_v31, %v3029_v6  ;;  %v881_v38 = vshrl.u32 %v598_v24, 16 }
  0x7f   : > { %v5105_v56 = vcombine.low %v845_v59, %v855_v34  ;;  %v862_v0 = vrot.slane %v860_v28, 5  ;;  %v868_v5 = vrot.slane %v866_v36, 5  ;;  %v5371_v32 = vcombine.low %v3027_v30, %v3030_v57  ;;  %v7129_v59 = vld [vmem:[%s6549_s27 + $0x98] sm:$0x1] }
  0x80   : > { %v872_v17 = vrot.slane %v870_v51, 4  ;;  %v878_v2 = vrot.slane %v876_v52, 5  ;;  %v884_v55 = vshll.u32 %v598_v24, 16  ;;  %v890_v20 = vshll.u32 %v7104_v29, 16  ;;  %v604_v24 = vld [vmem:[%s6549_s27 + $0x9c] sm:$0xf] }
  0x81   : > { %5810 = vmatmul.mubr.msk.bf16.gmra.mrb[16].mxu1 %vm313_vm1, %v5105_v56  ;;  %v863_v8 = vor.u32 %v862_v0, %v859_v44  ;;  %v894_v18 = vshrl.u32 %v7104_v29, 16  ;;  %5958 = vmatmul.mubr.msk.bf16.gmra.mrb[28].mxu0 %vm313_vm1, %v5371_v32  ;;  %v883_v3 = vrot.slane %v881_v38, 4  ;;  %v900_v50 = vshll.u32 %v7116_v45, 16  ;;  %v7136_v51 = vld [vmem:[%s6549_s27 + $0xa0] sm:$0xf]  ;;  %v6405_v32 = vld [vmem:[%s6549_s27 + $0x24] sm:$0xff]  }
  0x82   : > { %v873_v21 = vor.u32 %v872_v17, %v868_v5  ;;  %v905_v54 = vshrl.u32 %v601_v37, 16  ;;  %v886_v26 = vrot.slane %v884_v55, 5  ;;  %v892_v30 = vrot.slane %v890_v20, 5  ;;  %5963 = vmatprep.mubr.msk.bf16.mxu0 %vm313_vm1, %v6404_v27 }
  0x83   : > { %v864_v6 = vrot.slane %v863_v8, 4  ;;  %v896_v31 = vrot.slane %v894_v18, 4  ;;  %v902_v36 = vrot.slane %v900_v50, 5  ;;  %v908_v44 = vshll.u32 %v601_v37, 16  ;;  %v7147_v8 = vld [vmem:[%s6549_s27 + $0xa4] sm:$0x1] }
  0x84   : > { %v874_v28 = vrot.slane %v873_v21, 4  ;;  %v907_v34 = vrot.slane %v905_v54, 4  ;;  %v887_v56 = vor.u32 %v886_v26, %v883_v3  ;;  %v914_v0 = vshll.u32 %v7123_v49, 16  ;;  %v6406_v21 = vld [vmem:[%s6549_s27 + $0x30] sm:$0xff]   ;;  %v607_v26 = vld [vmem:[%s6549_s27 + $0xa8] sm:$0xf] }
  0x85   : > { %v869_v52 = vsel %vm6606_vm4, %v864_v6, %v868_v5  ;;  %v897_v57 = vor.u32 %v896_v31, %v892_v30  ;;  %v910_v17 = vrot.slane %v908_v44, 5  ;;  %v918_v38 = vshrl.u32 %v7123_v49, 16 }
  0x86   : > { %v879_v27 = vsel %vm6606_vm4, %v874_v28, %v878_v2  ;;  %v924_v37 = vshll.u32 %v7129_v59, 16  ;;  %v888_v20 = vrot.slane %v887_v56, 4  ;;  %v916_v18 = vrot.slane %v914_v0, 5 }
  0x87   : > { %v5106_v55 = vcombine.low %v869_v52, %v879_v27  ;;  %v898_v5 = vrot.slane %v897_v57, 4  ;;  %v911_v3 = vor.u32 %v910_v17, %v907_v34  ;;  %v920_v50 = vrot.slane %v918_v38, 4  ;;  %v7158_v52 = vld [vmem:[%s6549_s27 + $0xac] sm:$0xf]  ;;  %v7169_v38 = vld [vmem:[%s6549_s27 + $0xb0] sm:$0x1] }
  0x88   : > { %v926_v54 = vrot.slane %v924_v37, 5  ;;  %v929_v6 = vshrl.u32 %v604_v24, 16  ;;  %v893_v2 = vsel %vm6606_vm4, %v888_v20, %v892_v30  ;;  %v932_v28 = vshll.u32 %v604_v24, 16 }
  0x89   : > { %5813 = vmatprep.mubr.msk.bf16.mxu1 %vm313_vm1, %v5106_v55  ;;  %v903_v31 = vsel %vm6606_vm4, %v898_v5, %v902_v36  ;;  %v938_v44 = vshll.u32 %v7136_v51, 16  ;;  %5964 = vmatmul.mubr.msk.bf16.vlgmr.msra.gmra.mrb[0].mxu0 %vm313_vm1, %v6405_v32  ;;  %v912_v34 = vrot.slane %v911_v3, 4  ;;  %v921_v57 = vor.u32 %v920_v50, %v916_v18  ;;  %v610_v50 = vld [vmem:[%s6549_s27 + $0xb4] sm:$0xf] }
  0x8a   : > { %v5107_v56 = vcombine.low %v893_v2, %v903_v31  ;;  %v931_v0 = vrot.slane %v929_v6, 4  ;;  %5996 = vmatpush3.bf16.msra.mxu0 %v6613_v46  ;;  %v934_v27 = vrot.slane %v932_v28, 5  ;;  %v942_v36 = vshrl.u32 %v7136_v51, 16  ;;  %5967 = vmatprep.mubr.msk.bf16.mxu0 %vm313_vm1, %v6406_v21  ;;  %v6407_v6 = vld [vmem:[%s6549_s27 + $0x3c] sm:$0xff]   ;;  %v7178_v28 = vld [vmem:[%s6549_s27 + $0xb8] sm:$0xf] }
  0x8b   : > { %v940_v30 = vrot.slane %v938_v44, 5  ;;  %v948_v24 = vshll.u32 %v7147_v8, 16  ;;  %v917_v32 = vsel %vm6606_vm4, %v912_v34, %v916_v18  ;;  %v922_v17 = vrot.slane %v921_v57, 4  ;;  %v6408_v57 = vld [vmem:[%s6549_s27 + $0x48] sm:$0xff]  }
  0x8c   : > { %5814 = vmatmul.mubr.msk.bf16.gmra.mrb[20].mxu1 %vm313_vm1, %v5107_v56  ;;  %v953_v46 = vshrl.u32 %v607_v26, 16  ;;  %v956_v37 = vshll.u32 %v607_v26, 16  ;;  %v935_v55 = vor.u32 %v934_v27, %v931_v0  ;;  %v944_v20 = vrot.slane %v942_v36, 4 }
  0x8d   : > { %v950_v5 = vrot.slane %v948_v24, 5  ;;  %v962_v3 = vshll.u32 %v7158_v52, 16  ;;  %v927_v21 = vsel %vm6606_vm4, %v922_v17, %v926_v54  ;;  %v966_v18 = vshrl.u32 %v7158_v52, 16  ;;  %v7185_v54 = vld [vmem:[%s8154_s1 + $0x10] sm:$0x3] }
  0x8e   : > { %v955_v2 = vrot.slane %v953_v46, 4  ;;  %v958_v31 = vrot.slane %v956_v37, 5  ;;  %v5108_v44 = vcombine.low %v917_v32, %v927_v21  ;;  %v936_v26 = vrot.slane %v935_v55, 4  ;;  %v7191_v46 = vld [vmem:[%s6549_s27 + $0xbc] sm:$0x1]  ;;  %6362 = vmatprep.subr.msk.bf16.mxu0 %vm362_vm0, %v7185_v54 }
  0x8f   : > { %v945_v56 = vor.u32 %v944_v20, %v940_v30  ;;  %v964_v34 = vrot.slane %v962_v3, 5  ;;  %v968_v27 = vrot.slane %v966_v18, 4  ;;  %v972_v36 = vshll.u32 %v7169_v38, 16 }
  0x90   : > { %v959_v0 = vor.u32 %v958_v31, %v955_v2  ;;  %v977_v24 = vshrl.u32 %v610_v50, 16  ;;  %5817 = vmatprep.mubr.msk.bf16.mxu1 %vm313_vm1, %v5108_v44  ;;  %v941_v32 = vsel %vm6606_vm4, %v936_v26, %v940_v30  ;;  %v980_v37 = vshll.u32 %v610_v50, 16  ;;  %v1294_v31 = vld [vmem:[%s6549_s27] sm:$0xe]  ;;  %v1295_v26 = vld [vmem:[%s6549_s27 + $0xc] sm:$0xe] }
  0x91   : > { %v946_v17 = vrot.slane %v945_v56, 4  ;;  %v986_v55 = vshll.u32 %v7178_v28, 16  ;;  %5968 = vmatmul.mubr.msk.bf16.gmra.mrb[4].mxu0 %vm313_vm1, %v6407_v6  ;;  %v969_v3 = vor.u32 %v968_v27, %v964_v34  ;;  %v974_v21 = vrot.slane %v972_v36, 5 }
  0x92   : > { %v960_v20 = vrot.slane %v959_v0, 4  ;;  %v979_v2 = vrot.slane %v977_v24, 4  ;;  %v982_v18 = vrot.slane %v980_v37, 5  ;;  %v990_v50 = vshrl.u32 %v7178_v28, 16  ;;  %5971 = vmatprep.mubr.msk.bf16.mxu0 %vm313_vm1, %v6408_v57  ;;  %v1296_v37 = vld [vmem:[%s6549_s27 + $0x18] sm:$0xe] }
  0x93   : > { %v951_v30 = vsel %vm6606_vm4, %v946_v17, %v950_v5  ;;  %v988_v44 = vrot.slane %v986_v55, 5  ;;  %v970_v0 = vrot.slane %v969_v3, 4  ;;  %v996_v27 = vshll.u32 %v7191_v46, 16  ;;  %v6444_v5 = vld [vmem:[%s6549_s27 + $0x4] sm:$0xf] }
  0x94   : > { %v5109_v56 = vcombine.low %v941_v32, %v951_v30  ;;  %v965_v6 = vsel %vm6606_vm4, %v960_v20, %v964_v34  ;;  %v983_v36 = vor.u32 %v982_v18, %v979_v2  ;;  %v992_v24 = vrot.slane %v990_v50, 4  ;;  %v6409_v32 = vld [vmem:[%s6549_s27 + $0x54] sm:$0xff]   ;;  %v6410_v18 = vld [vmem:[%s6549_s27 + $0x60] sm:$0xff]  }
  0x95   : > { %v5128_v25 = vrot.slane %v1294_v31, 9  ;;  %v1363_v17 = vrot.slane %v6444_v5, 5  ;;  %v975_v57 = vsel %vm6606_vm4, %v970_v0, %v974_v21  ;;  %v998_v55 = vrot.slane %v996_v27, 5 }
  0x96   : > { %5818 = vmatmul.mubr.msk.bf16.gmra.mrb[24].mxu1 %vm313_vm1, %v5109_v56  ;;  %v1366_v30 = vrot.slane %v6811_v48, 5  ;;  %v5129_v34 = vrot.slane %v1295_v26, 9  ;;  %v5110_v20 = vcombine.low %v965_v6, %v975_v57  ;;  %v984_v3 = vrot.slane %v983_v36, 4 }
  0x97   : > { %v993_v2 = vor.u32 %v992_v24, %v988_v44  ;;  %v1364_v31 = vsel %vm6733_vm7, %v5128_v25, %v1363_v17  ;;  %v1365_v50 = vrot.slane %v1363_v17, 4  ;;  %v1370_v56 = vrot.slane %v6820_v60, 5  ;;  %v1297_v25 = vld [vmem:[%s6549_s27 + $0x24] sm:$0xe] }
  0x98   : > { %v1373_v5 = vrot.slane %v6831_v11, 5  ;;  %v5130_v21 = vrot.slane %v1296_v37, 9  ;;  %5821 = vmatprep.mubr.msk.bf16.mxu1 %vm313_vm1, %v5110_v20  ;;  %v989_v48 = vsel %vm6606_vm4, %v984_v3, %v988_v44  ;;  %v1377_v6 = vrot.slane %v6858_v35, 5  ;;  %v1298_v35 = vld [vmem:[%s6549_s27 + $0x30] sm:$0xe] }
  0x99   : > { %v994_v26 = vrot.slane %v993_v2, 4  ;;  %v1380_v0 = vrot.slane %v6870_v58, 5  ;;  %5972 = vmatmul.mubr.msk.bf16.gmra.mrb[8].mxu0 %vm313_vm1, %v6409_v32  ;;  %v1367_v60 = vsel %vm6733_vm7, %v1365_v50, %v1366_v30  ;;  %v7229_v11 = vsel %vm6733_vm7, %v5129_v34, %v1370_v56  ;;  %v1299_v34 = vld [vmem:[%s6549_s27 + $0x3c] sm:$0xe]  ;;  %v1301_v50 = vld [vmem:[%s6549_s27 + $0x54] sm:$0xe] }
  0x9a   : > { %v1372_v27 = vrot.slane %v1370_v56, 4  ;;  %v7233_v44 = vsel %vm362_vm0, %v7084_v43, 0  ;;  %v5145_v36 = vcombine.low %v1364_v31, %v1367_v60  ;;  %5975 = vmatprep.mubr.msk.bf16.mxu0 %vm313_vm1, %v6410_v18  ;;  %v1378_v24 = vsel %vm6733_vm7, %v5130_v21, %v1377_v6  ;;  %v6411_v43 = vld [vmem:[%s6549_s27 + $0x6c] sm:$0xff]   ;;  %v6412_v2 = vld [vmem:[%s6549_s27 + $0x78] sm:$0xff]   ;;  %v1300_v18 = vld [vmem:[%s6549_s27 + $0x48] sm:$0xe] }
  0x9b   : > { %v999_v58 = vsel %vm6606_vm4, %v994_v26, %v998_v55  ;;  %v1379_v17 = vrot.slane %v1377_v6, 4  ;;  %v5131_v32 = vrot.slane %v1297_v25, 9  ;;  %v1384_v30 = vrot.slane %v6890_v14, 5 }
  0x9c   : > { %v5111_v37 = vcombine.low %v989_v48, %v999_v58  ;;  %v1374_v57 = vsel %vm6733_vm7, %v1372_v27, %v1373_v5  ;;  %v1387_v3 = vrot.slane %v6895_v15, 5  ;;  %v5132_v31 = vrot.slane %v1298_v35, 9 }
  0x9d   : > { %v5146_v55 = vcombine.low %v7229_v11, %v1374_v57  ;;  %v1381_v20 = vsel %vm6733_vm7, %v1379_v17, %v1380_v0  ;;  %v7256_v5 = vsel %vm6733_vm7, %v5131_v32, %v1384_v30  ;;  %v1386_v14 = vrot.slane %v1384_v30, 4 }
  0x9e   : > { %5822 = vmatmul.mubr.msk.bf16.gmra.mrb[28].mxu1 %vm313_vm1, %v5111_v37  ;;  %v5147_v56 = vcombine.low %v1378_v24, %v1381_v20  ;;  %v1391_v21 = vrot.slane %v6942_v9, 5  ;;  %v1394_v48 = vrot.slane %v6950_v7, 5  ;;  %v5133_v26 = vrot.slane %v1299_v34, 9  ;;  %v1302_v24 = vld [vmem:[%s6549_s27 + $0x60] sm:$0xe]  ;;  %v6413_v20 = vld [vmem:[%s6549_s27 + $0x84] sm:$0xff]  }
  0x9f   : > { %5827 = vmatprep.mubr.msk.bf16.mxu1 %vm313_vm1, %v5145_v36  ;;  %v1398_v15 = vrot.slane %v6966_v41, 5  ;;  %v1401_v6 = vrot.slane %v6969_v23, 5  ;;  %v7265_v0 = vsel %vm6733_vm7, %v1386_v14, %v1387_v3  ;;  %v5134_v9 = vrot.slane %v1300_v18, 9 }
  0xa0   : > { %v7269_v25 = vsel %vm6733_vm7, %v5132_v31, %v1391_v21  ;;  %v1393_v60 = vrot.slane %v1391_v21, 4  ;;  %v5148_v7 = vcombine.low %v7256_v5, %v7265_v0  ;;  %v1405_v11 = vrot.slane %v6991_v16, 5 }
  0xa1   : > { %v7275_v41 = vsel %vm6733_vm7, %v5133_v26, %v1398_v15  ;;  %v1400_v23 = vrot.slane %v1398_v15, 4  ;;  %5976 = vmatmul.mubr.msk.bf16.gmra.mrb[12].mxu0 %vm313_vm1, %v6411_v43  ;;  %v1408_v35 = vrot.slane %v6996_v19, 5  ;;  %v5135_v58 = vrot.slane %v1301_v50, 9  ;;  %v1303_v43 = vld [vmem:[%s6549_s27 + $0x6c] sm:$0xe] }
  0xa2   : > { %v7281_v27 = vsel %vm6733_vm7, %v1393_v60, %v1394_v48  ;;  %v1412_v36 = vrot.slane %v7011_v39, 5  ;;  %5979 = vmatprep.mubr.msk.bf16.mxu0 %vm313_vm1, %v6412_v2  ;;  %v7295_v37 = vsel %vm6733_vm7, %v5134_v9, %v1405_v11  ;;  %v1407_v57 = vrot.slane %v1405_v11, 4  ;;  %v1304_v19 = vld [vmem:[%s6549_s27 + $0x78] sm:$0xe]  ;;  %v1305_v48 = vld [vmem:[%s6549_s27 + $0x84] sm:$0xe] }
  0xa3   : > { %v5149_v17 = vcombine.low %v7269_v25, %v7281_v27  ;;  %v7291_v16 = vsel %vm6733_vm7, %v1400_v23, %v1401_v6  ;;  %v1415_v34 = vrot.slane %v7018_v10, 5  ;;  %v5136_v2 = vrot.slane %v1302_v24, 9  ;;  %v5453_v6 = vld [vmem:[%s6549_s27 + $0x18] sm:$0xf]  ;;  %v7339_v9 = vld [vmem:[%s6549_s27 + $0x1c] sm:$0xf] }
  0xa4   : > { %v5150_v39 = vcombine.low %v7275_v41, %v7291_v16  ;;  %v7303_v32 = vsel %vm6733_vm7, %v5135_v58, %v1412_v36  ;;  %v1414_v30 = vrot.slane %v1412_v36, 4  ;;  %v7309_v3 = vsel %vm6733_vm7, %v1407_v57, %v1408_v35  ;;  %v6445_v23 = vld [vmem:[%s8154_s1 + $0x8] sm:$0x3]  ;;  %v7352_v36 = vld [vmem:[%s6549_s27 + $0x20] sm:$0x1] }
  0xa5   : > { %v1419_v31 = vrot.slane %v7040_v40, 5  ;;  %v1422_v18 = vrot.slane %v7049_v22, 5  ;;  %v5151_v50 = vcombine.low %v7295_v37, %v7309_v3  ;;  %v5137_v10 = vrot.slane %v1303_v43, 9  ;;  %v6414_v40 = vld [vmem:[%s6549_s27 + $0x90] sm:$0xff]   ;;  %v5456_v43 = vld [vmem:[%s6549_s27 + $0x24] sm:$0xf] }
  0xa6   : > { %5828 = vmatmul.mubr.msk.bf16.vlgmr.msra.gmra.mrb[0].mxu1 %vm313_vm1, %v5146_v55  ;;  %v7318_v14 = vsel %vm6733_vm7, %v1414_v30, %v1415_v34  ;;  %v1426_v21 = vrot.slane %v7053_v62, 5  ;;  %v1429_v15 = vrot.slane %v7058_v13, 5  ;;  %v1433_v60 = vrot.slane %v7091_v33, 5 }
  0xa7   : > { %5831 = vmatprep.mubr.msk.bf16.mxu1 %vm313_vm1, %v5147_v56  ;;  %5860 = vmatpush3.bf16.msra.mxu1 %v7233_v44  ;;  %v5152_v22 = vcombine.low %v7303_v32, %v7318_v14  ;;  %v7329_v55 = vsel %vm6733_vm7, %v5136_v2, %v1419_v31  ;;  %v1421_v26 = vrot.slane %v1419_v31, 4  ;;  %v5138_v44 = vrot.slane %v1304_v19, 9 }
  0xa8   : > { %v7335_v62 = vsel %vm6733_vm7, %v5137_v10, %v1426_v21  ;;  %v1428_v56 = vrot.slane %v1426_v21, 4  ;;  %6358 = vmatprep.subr.msk.bf16.mxu1 %vm362_vm0, %v6445_v23  ;;  %v1436_v11 = vrot.slane %v7094_v61, 5  ;;  %v5139_v35 = vrot.slane %v1305_v48, 9  ;;  %v6416_v23 = vld [vmem:[%s6549_s27 + $0xa8] sm:$0xff]  }
  0xa9   : > { %v7347_v13 = vsel %vm6733_vm7, %v1421_v26, %v1422_v18  ;;  %v1440_v58 = vrot.slane %v7104_v29, 5  ;;  %5980 = vmatmul.mubr.msk.bf16.gmra.mrb[16].mxu0 %vm313_vm1, %v6413_v20  ;;  %v7363_v57 = vsel %vm6733_vm7, %v5138_v44, %v1433_v60  ;;  %v1435_v61 = vrot.slane %v1433_v60, 4  ;;  %v7391_v26 = vld [vmem:[%s6549_s27 + $0x2c] sm:$0x1] }
  0xaa   : > { %v5153_v33 = vcombine.low %v7329_v55, %v7347_v13  ;;  %v7359_v24 = vsel %vm6733_vm7, %v1428_v56, %v1429_v15  ;;  %5983 = vmatprep.mubr.msk.bf16.mxu0 %vm313_vm1, %v6414_v40  ;;  %v1443_v34 = vrot.slane %v7116_v45, 5  ;;  %v3736_v2 = vshrl.u32 %v5453_v6, 16  ;;  %v7388_v40 = vld [vmem:[%s6549_s27 + $0x28] sm:$0xf]  ;;  %v6415_v15 = vld [vmem:[%s6549_s27 + $0x9c] sm:$0xff]  }
  0xab   : > { %v5154_v29 = vcombine.low %v7335_v62, %v7359_v24  ;;  %v7371_v19 = vsel %vm6733_vm7, %v5139_v35, %v1440_v58  ;;  %v1442_v30 = vrot.slane %v1440_v58, 4  ;;  %v7376_v20 = vsel %vm6733_vm7, %v1435_v61, %v1436_v11  ;;  %v7508_v55 = vld [vmem:[%s6549_s27 + $0x50] sm:$0x1] }
  0xac   : > { %v3739_v31 = vshll.u32 %v5453_v6, 16  ;;  %v3745_v18 = vshll.u32 %v7339_v9, 16  ;;  %v5155_v10 = vcombine.low %v7363_v57, %v7376_v20  ;;  %v3749_v48 = vshrl.u32 %v7339_v9, 16 }
  0xad   : > { %v7383_v21 = vsel %vm6733_vm7, %v1442_v30, %v1443_v34  ;;  %v3755_v45 = vshll.u32 %v7352_v36, 16  ;;  %v3738_v56 = vrot.slane %v3736_v2, 4  ;;  %v3760_v5 = vshrl.u32 %v5456_v43, 16  ;;  %v1306_v34 = vld [vmem:[%s6549_s27 + $0x90] sm:$0xe] }
  0xae   : > { %5832 = vmatmul.mubr.msk.bf16.gmra.mrb[4].mxu1 %vm313_vm1, %v5148_v7  ;;  %v5156_v6 = vcombine.low %v7371_v19, %v7383_v21  ;;  %v3741_v44 = vrot.slane %v3739_v31, 5  ;;  %v3747_v60 = vrot.slane %v3745_v18, 5  ;;  %v3751_v11 = vrot.slane %v3749_v48, 4 }
  0xaf   : > { %5835 = vmatprep.mubr.msk.bf16.mxu1 %vm313_vm1, %v5149_v17  ;;  %v3757_v35 = vrot.slane %v3755_v45, 5  ;;  %v3763_v0 = vshll.u32 %v5456_v43, 16  ;;  %v3769_v58 = vshll.u32 %v7388_v40, 16  ;;  %v3773_v61 = vshrl.u32 %v7388_v40, 16  ;;  %v1307_v17 = vld [vmem:[%s6549_s27 + $0x9c] sm:$0xe] }
  0xb0   : > { %v3742_v7 = vor.u32 %v3741_v44, %v3738_v56  ;;  %v3779_v30 = vshll.u32 %v7391_v26, 16  ;;  %v3752_v2 = vor.u32 %v3751_v11, %v3747_v60  ;;  %v3762_v31 = vrot.slane %v3760_v5, 4  ;;  %v5459_v56 = vld [vmem:[%s6549_s27 + $0x30] sm:$0xf] }
  0xb1   : > { %v3765_v25 = vrot.slane %v3763_v0, 5  ;;  %v7411_v27 = vsel %vm362_vm0, %v7185_v54, 0  ;;  %5984 = vmatmul.mubr.msk.bf16.gmra.mrb[20].mxu0 %vm313_vm1, %v6415_v15  ;;  %v3771_v18 = vrot.slane %v3769_v58, 5  ;;  %v3775_v48 = vrot.slane %v3773_v61, 4  ;;  %v6417_v58 = vld [vmem:[%s6549_s27 + $0xb4] sm:$0xff]  }
  0xb2   : > { %v3743_v43 = vrot.slane %v3742_v7, 4  ;;  %v3781_v45 = vrot.slane %v3779_v30, 5  ;;  %5987 = vmatprep.mubr.msk.bf16.mxu0 %vm313_vm1, %v6416_v23  ;;  %v3753_v44 = vrot.slane %v3752_v2, 4  ;;  %v5140_v5 = vrot.slane %v1306_v34, 9  ;;  %v7429_v34 = vld [vmem:[%s6549_s27 + $0x34] sm:$0xf] }
  0xb3   : > { %v3766_v11 = vor.u32 %v3765_v25, %v3762_v31  ;;  %v1447_v0 = vrot.slane %v7123_v49, 5  ;;  %v3776_v53 = vor.u32 %v3775_v48, %v3771_v18  ;;  %v1450_v15 = vrot.slane %v7129_v59, 5  ;;  %v6418_v59 = vld [vmem:[%s6549_s27 + $0xc0] sm:$0xff]   ;;  %v7441_v25 = vld [vmem:[%s6549_s27 + $0x38] sm:$0x1] }
  0xb4   : > { %v3748_v54 = vsel %vm6606_vm4, %v3743_v43, %v3747_v60  ;;  %v5141_v7 = vrot.slane %v1307_v17, 9  ;;  %v3758_v61 = vsel %vm6606_vm4, %v3753_v44, %v3757_v35  ;;  %v1454_v2 = vrot.slane %v7136_v51, 5  ;;  %v5462_v17 = vld [vmem:[%s6549_s27 + $0x3c] sm:$0xf]  ;;  %v7455_v51 = vld [vmem:[%s6549_s27 + $0x40] sm:$0xf] }
  0xb5   : > { %v3767_v30 = vrot.slane %v3766_v11, 4  ;;  %v7426_v23 = vsel %vm6733_vm7, %v5140_v5, %v1447_v0  ;;  %v1449_v49 = vrot.slane %v1447_v0, 4  ;;  %v7436_v60 = vcombine.low %v3748_v54, %v3758_v61  ;;  %v7466_v43 = vld [vmem:[%s6549_s27 + $0x44] sm:$0x1] }
  0xb6   : > { %5836 = vmatmul.mubr.msk.bf16.gmra.mrb[8].mxu1 %vm313_vm1, %v5150_v39  ;;  %v3777_v35 = vrot.slane %v3776_v53, 4  ;;  %v1457_v31 = vrot.slane %v7147_v8, 5  ;;  %v3784_v39 = vshrl.u32 %v5459_v56, 16  ;;  %v3787_v53 = vshll.u32 %v5459_v56, 16 }
  0xb7   : > { %5839 = vmatprep.mubr.msk.bf16.mxu1 %vm313_vm1, %v5151_v50  ;;  %v3772_v41 = vsel %vm6606_vm4, %v3767_v30, %v3771_v18  ;;  %v7451_v16 = vsel %vm6733_vm7, %v1449_v49, %v1450_v15  ;;  %v7463_v3 = vsel %vm6733_vm7, %v5141_v7, %v1454_v2  ;;  %v1456_v50 = vrot.slane %v1454_v2, 4 }
  0xb8   : > { %v3782_v8 = vsel %vm6606_vm4, %v3777_v35, %v3781_v45  ;;  %v5157_v37 = vcombine.low %v7426_v23, %v7451_v16  ;;  %v3786_v48 = vrot.slane %v3784_v39, 4  ;;  %v3789_v56 = vrot.slane %v3787_v53, 5  ;;  %v6419_v53 = vld [vmem:[%s6549_s27 + $0xcc] sm:$0xff]  }
  0xb9   : > { %v7468_v18 = vcombine.low %v3772_v41, %v3782_v8  ;;  %v3793_v44 = vshll.u32 %v7429_v34, 16  ;;  %5988 = vmatmul.mubr.msk.bf16.gmra.mrb[24].mxu0 %vm313_vm1, %v6417_v58  ;;  %v7474_v45 = vsel %vm6733_vm7, %v1456_v50, %v1457_v31  ;;  %v3797_v11 = vshrl.u32 %v7429_v34, 16  ;;  %v1308_v58 = vld [vmem:[%s6549_s27 + $0xa8] sm:$0xe] }
  0xba   : > { %v3803_v5 = vshll.u32 %v7441_v25, 16  ;;  %v3808_v0 = vshrl.u32 %v5462_v17, 16  ;;  %5991 = vmatprep.mubr.msk.bf16.mxu0 %vm313_vm1, %v6418_v59  ;;  %v5158_v54 = vcombine.low %v7463_v3, %v7474_v45  ;;  %v3790_v15 = vor.u32 %v3789_v56, %v3786_v48  ;;  %v1309_v56 = vld [vmem:[%s6549_s27 + $0xb4] sm:$0xe] }
  0xbb   : > { %v3795_v7 = vrot.slane %v3793_v44, 5  ;;  %v3811_v61 = vshll.u32 %v5462_v17, 16  ;;  %v3799_v30 = vrot.slane %v3797_v11, 4  ;;  %v3817_v2 = vshll.u32 %v7455_v51, 16  ;;  %v5465_v11 = vld [vmem:[%s6549_s27 + $0x48] sm:$0xf] }
  0xbc   : > { %v3805_v49 = vrot.slane %v3803_v5, 5  ;;  %v3810_v35 = vrot.slane %v3808_v0, 4  ;;  %v3791_v31 = vrot.slane %v3790_v15, 4  ;;  %v3821_v39 = vshrl.u32 %v7455_v51, 16 }
  0xbd   : > { %v3813_v41 = vrot.slane %v3811_v61, 5  ;;  %v3827_v59 = vshll.u32 %v7466_v43, 16  ;;  %v3800_v17 = vor.u32 %v3799_v30, %v3795_v7  ;;  %v3819_v8 = vrot.slane %v3817_v2, 5  ;;  %v7505_v61 = vld [vmem:[%s6549_s27 + $0x4c] sm:$0xf] }
  0xbe   : > { %5840 = vmatmul.mubr.msk.bf16.gmra.mrb[12].mxu1 %vm313_vm1, %v5152_v22  ;;  %v5142_v50 = vrot.slane %v1308_v58, 9  ;;  %v1461_v48 = vrot.slane %v7158_v52, 5  ;;  %v3796_v44 = vsel %vm6606_vm4, %v3791_v31, %v3795_v7  ;;  %v3823_v14 = vrot.slane %v3821_v39, 4 }
  0xbf   : > { %5843 = vmatprep.mubr.msk.bf16.mxu1 %vm313_vm1, %v5153_v33  ;;  %v3814_v32 = vor.u32 %v3813_v41, %v3810_v35  ;;  %v3829_v22 = vrot.slane %v3827_v59, 5  ;;  %v3801_v5 = vrot.slane %v3800_v17, 4  ;;  %v1464_v52 = vrot.slane %v7169_v38, 5  ;;  %v7527_v59 = vld [vmem:[%s6549_s27 + $0x58] sm:$0xf] }
  0xc0   : > { %v7501_v0 = vsel %vm6733_vm7, %v5142_v50, %v1461_v48  ;;  %v1463_v15 = vrot.slane %v1461_v48, 4  ;;  %v3824_v33 = vor.u32 %v3823_v14, %v3819_v8  ;;  %v5143_v7 = vrot.slane %v1309_v56, 9  ;;  %v7534_v48 = vld [vmem:[%s6549_s27 + $0x5c] sm:$0x1] }
  0xc1   : > { %v3815_v13 = vrot.slane %v3814_v32, 4  ;;  %v1468_v58 = vrot.slane %v7178_v28, 5  ;;  %5992 = vmatmul.mubr.msk.bf16.gmra.mrb[28].mxu0 %vm313_vm1, %v6419_v53  ;;  %v3806_v30 = vsel %vm6606_vm4, %v3801_v5, %v3805_v49  ;;  %v1471_v35 = vrot.slane %v7191_v46, 5  ;;  %v5468_v49 = vld [vmem:[%s6549_s27 + $0x54] sm:$0xf] }
  0xc2   : > { %v7516_v38 = vsel %vm6733_vm7, %v1463_v15, %v1464_v52  ;;  %v3832_v2 = vshrl.u32 %v5465_v11, 16  ;;  %5997 = vmatprep.mubr.msk.bf16.mxu0 %vm313_vm1, %v7436_v60  ;;  %v5504_v31 = vcombine.low %v3796_v44, %v3806_v30  ;;  %v3825_v41 = vrot.slane %v3824_v33, 4  ;;  %v5471_v60 = vld [vmem:[%s6549_s27 + $0x60] sm:$0xf]  ;;  %v7561_v30 = vld [vmem:[%s6549_s27 + $0x68] sm:$0x1] }
  0xc3   : > { %v3820_v28 = vsel %vm6606_vm4, %v3815_v13, %v3819_v8  ;;  %v5159_v39 = vcombine.low %v7501_v0, %v7516_v38  ;;  %v7531_v53 = vsel %vm6733_vm7, %v5143_v7, %v1468_v58  ;;  %v1470_v46 = vrot.slane %v1468_v58, 4  ;;  %v7557_v13 = vld [vmem:[%s6549_s27 + $0x64] sm:$0xf] }
  0xc4   : > { %v3834_v17 = vrot.slane %v3832_v2, 4  ;;  %v3835_v50 = vshll.u32 %v5465_v11, 16  ;;  %v3830_v8 = vsel %vm6606_vm4, %v3825_v41, %v3829_v22  ;;  %v3841_v56 = vshll.u32 %v7505_v61, 16 }
  0xc5   : > { %v3845_v44 = vshrl.u32 %v7505_v61, 16  ;;  %v3851_v32 = vshll.u32 %v7508_v55, 16  ;;  %v5505_v14 = vcombine.low %v3820_v28, %v3830_v8  ;;  %v7548_v11 = vsel %vm6733_vm7, %v1470_v46, %v1471_v35 }
  0xc6   : > { %5844 = vmatmul.mubr.msk.bf16.gmra.mrb[16].mxu1 %vm313_vm1, %v5154_v29  ;;  %v3837_v5 = vrot.slane %v3835_v50, 5  ;;  %v3856_v15 = vshrl.u32 %v5468_v49, 16  ;;  %v5160_v22 = vcombine.low %v7531_v53, %v7548_v11  ;;  %v3843_v52 = vrot.slane %v3841_v56, 5  ;;  %v7665_v11 = vld [vmem:[%s6549_s27 + $0xa4] sm:$0x1] }
  0xc7   : > { %5847 = vmatprep.mubr.msk.bf16.mxu1 %vm313_vm1, %v5155_v10  ;;  %v3847_v62 = vrot.slane %v3845_v44, 4  ;;  %v3853_v24 = vrot.slane %v3851_v32, 5  ;;  %v3859_v7 = vshll.u32 %v5468_v49, 16  ;;  %v3865_v58 = vshll.u32 %v7527_v59, 16 }
  0xc8   : > { %v3838_v29 = vor.u32 %v3837_v5, %v3834_v17  ;;  %v3858_v33 = vrot.slane %v3856_v15, 4  ;;  %v3869_v57 = vshrl.u32 %v7527_v59, 16  ;;  %v3875_v20 = vshll.u32 %v7534_v48, 16  ;;  %v5474_v5 = vld [vmem:[%s6549_s27 + $0x6c] sm:$0xf] }
  0xc9   : > { %v3848_v35 = vor.u32 %v3847_v62, %v3843_v52  ;;  %v3880_v10 = vshrl.u32 %v5471_v60, 16  ;;  %5998 = vmatmul.mubr.msk.bf16.vlgmr.msra.gmra.mrb[0].mxu0 %vm313_vm1, %v7468_v18  ;;  %v3861_v28 = vrot.slane %v3859_v7, 5  ;;  %v3867_v41 = vrot.slane %v3865_v58, 5  ;;  %v7578_v62 = vld [vmem:[%s6549_s27 + $0x70] sm:$0xf] }
  0xca   : > { %v3839_v2 = vrot.slane %v3838_v29, 4  ;;  %v3883_v46 = vshll.u32 %v5471_v60, 16  ;;  %6030 = vmatpush3.bf16.msra.mxu0 %v7411_v27  ;;  %6001 = vmatprep.mubr.msk.bf16.mxu0 %vm313_vm1, %v5504_v31  ;;  %v3871_v17 = vrot.slane %v3869_v57, 4  ;;  %v3877_v50 = vrot.slane %v3875_v20, 5  ;;  %v7589_v57 = vld [vmem:[%s6549_s27 + $0x74] sm:$0x1] }
  0xcb   : > { %v3849_v49 = vrot.slane %v3848_v35, 4  ;;  %v3882_v8 = vrot.slane %v3880_v10, 4  ;;  %v3862_v44 = vor.u32 %v3861_v28, %v3858_v33  ;;  %v3889_v18 = vshll.u32 %v7557_v13, 16 }
  0xcc   : > { %v3844_v56 = vsel %vm6606_vm4, %v3839_v2, %v3843_v52  ;;  %v3885_v32 = vrot.slane %v3883_v46, 5  ;;  %v3872_v15 = vor.u32 %v3871_v17, %v3867_v41  ;;  %v3893_v27 = vshrl.u32 %v7557_v13, 16  ;;  %v5477_v2 = vld [vmem:[%s6549_s27 + $0x78] sm:$0xf]  ;;  %v7599_v46 = vld [vmem:[%s6549_s27 + $0x7c] sm:$0xf] }
  0xcd   : > { %v3854_v60 = vsel %vm6606_vm4, %v3849_v49, %v3853_v24  ;;  %v3899_v31 = vshll.u32 %v7561_v30, 16  ;;  %v3863_v29 = vrot.slane %v3862_v44, 4  ;;  %v3891_v7 = vrot.slane %v3889_v18, 5 }
  0xce   : > { %5848 = vmatmul.mubr.msk.bf16.gmra.mrb[20].mxu1 %vm313_vm1, %v5156_v6  ;;  %v5506_v52 = vcombine.low %v3844_v56, %v3854_v60  ;;  %v3886_v33 = vor.u32 %v3885_v32, %v3882_v8  ;;  %v3873_v24 = vrot.slane %v3872_v15, 4  ;;  %v3895_v58 = vrot.slane %v3893_v27, 4  ;;  %v7607_v32 = vld [vmem:[%s6549_s27 + $0x80] sm:$0x1]  ;;  %v5480_v27 = vld [vmem:[%s6549_s27 + $0x84] sm:$0xf] }
  0xcf   : > { %5851 = vmatprep.mubr.msk.bf16.mxu1 %vm313_vm1, %v5157_v37  ;;  %v3901_v35 = vrot.slane %v3899_v31, 5  ;;  %v3904_v20 = vshrl.u32 %v5474_v5, 16  ;;  %v3868_v19 = vsel %vm6606_vm4, %v3863_v29, %v3867_v41  ;;  %v3907_v6 = vshll.u32 %v5474_v5, 16 }
  0xd0   : > { %v3887_v21 = vrot.slane %v3886_v33, 4  ;;  %v3913_v10 = vshll.u32 %v7578_v62, 16  ;;  %v3878_v23 = vsel %vm6606_vm4, %v3873_v24, %v3877_v50  ;;  %v3896_v16 = vor.u32 %v3895_v58, %v3891_v7 }
  0xd1   : > { %v3906_v37 = vrot.slane %v3904_v20, 4  ;;  %v3917_v28 = vshrl.u32 %v7578_v62, 16  ;;  %6002 = vmatmul.mubr.msk.bf16.gmra.mrb[4].mxu0 %vm313_vm1, %v5505_v14  ;;  %v5507_v49 = vcombine.low %v3868_v19, %v3878_v23  ;;  %v3909_v17 = vrot.slane %v3907_v6, 5 }
  0xd2   : > { %v3892_v41 = vsel %vm6606_vm4, %v3887_v21, %v3891_v7  ;;  %v3915_v8 = vrot.slane %v3913_v10, 5  ;;  %6005 = vmatprep.mubr.msk.bf16.mxu0 %vm313_vm1, %v5506_v52  ;;  %v3897_v56 = vrot.slane %v3896_v16, 4  ;;  %v3923_v44 = vshll.u32 %v7589_v57, 16  ;;  %v7615_v7 = vld [vmem:[%s6549_s27 + $0x88] sm:$0xf] }
  0xd3   : > { %v3919_v50 = vrot.slane %v3917_v28, 4  ;;  %v3928_v18 = vshrl.u32 %v5477_v2, 16  ;;  %v3910_v5 = vor.u32 %v3909_v17, %v3906_v37  ;;  %v3931_v60 = vshll.u32 %v5477_v2, 16  ;;  %v5483_v16 = vld [vmem:[%s6549_s27 + $0x90] sm:$0xf] }
  0xd4   : > { %v3937_v14 = vshll.u32 %v7599_v46, 16  ;;  %v3941_v15 = vshrl.u32 %v7599_v46, 16  ;;  %v3902_v31 = vsel %vm6606_vm4, %v3897_v56, %v3901_v35  ;;  %v3925_v52 = vrot.slane %v3923_v44, 5  ;;  %v7636_v28 = vld [vmem:[%s6549_s27 + $0x94] sm:$0xf] }
  0xd5   : > { %v3920_v29 = vor.u32 %v3919_v50, %v3915_v8  ;;  %v3930_v33 = vrot.slane %v3928_v18, 4  ;;  %v5508_v24 = vcombine.low %v3892_v41, %v3902_v31  ;;  %v3911_v58 = vrot.slane %v3910_v5, 4  ;;  %v6420_v50 = vld [vmem:[%s6549_s27 + $0xc] sm:$0xff]  }
  0xd6   : > { %5852 = vmatmul.mubr.msk.bf16.gmra.mrb[24].mxu1 %vm313_vm1, %v5158_v54  ;;  %v3933_v20 = vrot.slane %v3931_v60, 5  ;;  %v3939_v19 = vrot.slane %v3937_v14, 5  ;;  %v3943_v21 = vrot.slane %v3941_v15, 4  ;;  %v3947_v6 = vshll.u32 %v7607_v32, 16  ;;  %v7629_v54 = vld [vmem:[%s6549_s27 + $0x8c] sm:$0x1] }
  0xd7   : > { %5855 = vmatprep.mubr.msk.bf16.mxu1 %vm313_vm1, %v5159_v39  ;;  %v3921_v35 = vrot.slane %v3920_v29, 4  ;;  %v3952_v10 = vshrl.u32 %v5480_v27, 16  ;;  %v3916_v3 = vsel %vm6606_vm4, %v3911_v58, %v3915_v8  ;;  %v3955_v2 = vshll.u32 %v5480_v27, 16  ;;  %v5486_v29 = vld [vmem:[%s6549_s27 + $0x9c] sm:$0xf] }
  0xd8   : > { %v3934_v45 = vor.u32 %v3933_v20, %v3930_v33  ;;  %v3961_v23 = vshll.u32 %v7615_v7, 16  ;;  %v3944_v38 = vor.u32 %v3943_v21, %v3939_v19  ;;  %v3949_v39 = vrot.slane %v3947_v6, 5  ;;  %v7653_v20 = vld [vmem:[%s6549_s27 + $0xa0] sm:$0xf] }
  0xd9   : > { %v3926_v0 = vsel %vm6606_vm4, %v3921_v35, %v3925_v52  ;;  %v3954_v37 = vrot.slane %v3952_v10, 4  ;;  %6006 = vmatmul.mubr.msk.bf16.gmra.mrb[8].mxu0 %vm313_vm1, %v5507_v49  ;;  %v3957_v8 = vrot.slane %v3955_v2, 5  ;;  %v3965_v18 = vshrl.u32 %v7615_v7, 16  ;;  %v7646_v49 = vld [vmem:[%s6549_s27 + $0x98] sm:$0x1] }
  0xda   : > { %v5509_v41 = vcombine.low %v3916_v3, %v3926_v0  ;;  %v3935_v17 = vrot.slane %v3934_v45, 4  ;;  %v3963_v56 = vrot.slane %v3961_v23, 5  ;;  %6009 = vmatprep.mubr.msk.bf16.mxu0 %vm313_vm1, %v5508_v24  ;;  %v3945_v44 = vrot.slane %v3944_v38, 4  ;;  %v5489_v0 = vld [vmem:[%s6549_s27 + $0xa8] sm:$0xf] }
  0xdb   : > { %v3971_v5 = vshll.u32 %v7629_v54, 16  ;;  %v3976_v60 = vshrl.u32 %v5483_v16, 16  ;;  %v3958_v15 = vor.u32 %v3957_v8, %v3954_v37  ;;  %v3979_v27 = vshll.u32 %v5483_v16, 16  ;;  %v6421_v8 = vld [vmem:[%s6549_s27 + $0x18] sm:$0xff]  }
  0xdc   : > { %v3940_v14 = vsel %vm6606_vm4, %v3935_v17, %v3939_v19  ;;  %v3985_v31 = vshll.u32 %v7636_v28, 16  ;;  %v3950_v52 = vsel %vm6606_vm4, %v3945_v44, %v3949_v39  ;;  %v3967_v33 = vrot.slane %v3965_v18, 4 }
  0xdd   : > { %v3973_v24 = vrot.slane %v3971_v5, 5  ;;  %v3978_v58 = vrot.slane %v3976_v60, 4  ;;  %v5510_v19 = vcombine.low %v3940_v14, %v3950_v52  ;;  %v3959_v35 = vrot.slane %v3958_v15, 4  ;;  %v6422_v5 = vld [vmem:[%s6549_s27 + $0x24] sm:$0xff]  }
  0xde   : > { %5856 = vmatmul.mubr.msk.bf16.gmra.mrb[28].mxu1 %vm313_vm1, %v5160_v22  ;;  %v3981_v21 = vrot.slane %v3979_v27, 5  ;;  %v3987_v6 = vrot.slane %v3985_v31, 5  ;;  %v3968_v10 = vor.u32 %v3967_v33, %v3963_v56  ;;  %v3989_v3 = vshrl.u32 %v7636_v28, 16  ;;  %v7678_v27 = vld [vmem:[%s6549_s27 + $0xac] sm:$0xf] }
  0xdf   : > { %5861 = vmatprep.mubr.msk.bf16.mxu1 %vm313_vm1, %v6420_v50  ;;  %v3995_v45 = vshll.u32 %v7646_v49, 16  ;;  %v4000_v2 = vshrl.u32 %v5486_v29, 16  ;;  %v3964_v23 = vsel %vm6606_vm4, %v3959_v35, %v3963_v56  ;;  %v4003_v22 = vshll.u32 %v5486_v29, 16  ;;  %v5492_v35 = vld [vmem:[%s6549_s27 + $0xb4] sm:$0xf] }
  0xe0   : > { %v3982_v53 = vor.u32 %v3981_v21, %v3978_v58  ;;  %v4009_v16 = vshll.u32 %v7653_v20, 16  ;;  %v3969_v38 = vrot.slane %v3968_v10, 4  ;;  %v3991_v39 = vrot.slane %v3989_v3, 4  ;;  %v7683_v58 = vld [vmem:[%s6549_s27 + $0xb0] sm:$0x1] }
  0xe1   : > { %v3997_v37 = vrot.slane %v3995_v45, 5  ;;  %v4002_v17 = vrot.slane %v4000_v2, 4  ;;  %6010 = vmatmul.mubr.msk.bf16.gmra.mrb[12].mxu0 %vm313_vm1, %v5509_v41  ;;  %v4005_v56 = vrot.slane %v4003_v22, 5  ;;  %v4013_v18 = vshrl.u32 %v7653_v20, 16 }
  0xe2   : > { %v3983_v50 = vrot.slane %v3982_v53, 4  ;;  %v4011_v44 = vrot.slane %v4009_v16, 5  ;;  %6013 = vmatprep.mubr.msk.bf16.mxu0 %vm313_vm1, %v5510_v19  ;;  %v3974_v60 = vsel %vm6606_vm4, %v3969_v38, %v3973_v24  ;;  %v3992_v14 = vor.u32 %v3991_v39, %v3987_v6  ;;  %v7695_v16 = vld [vmem:[%s6549_s27 + $0xb8] sm:$0xf] }
  0xe3   : > { %v4019_v15 = vshll.u32 %v7665_v11, 16  ;;  %v4024_v31 = vshrl.u32 %v5489_v0, 16  ;;  %v5511_v41 = vcombine.low %v3964_v23, %v3974_v60  ;;  %v4006_v52 = vor.u32 %v4005_v56, %v4002_v17  ;;  %v6423_v60 = vld [vmem:[%s6549_s27 + $0x30] sm:$0xff]  }
  0xe4   : > { %v3988_v29 = vsel %vm6606_vm4, %v3983_v50, %v3987_v6  ;;  %v4015_v33 = vrot.slane %v4013_v18, 4  ;;  %v3993_v19 = vrot.slane %v3992_v14, 4  ;;  %v4027_v24 = vshll.u32 %v5489_v0, 16  ;;  %v7700_v50 = vld [vmem:[%s6549_s27 + $0xbc] sm:$0x1] }
  0xe5   : > { %v4021_v21 = vrot.slane %v4019_v15, 5  ;;  %v4026_v10 = vrot.slane %v4024_v31, 4  ;;  %v4007_v3 = vrot.slane %v4006_v52, 4  ;;  %v4033_v2 = vshll.u32 %v7678_v27, 16 }
  0xe6   : > { %5862 = vmatmul.mubr.msk.bf16.vlgmr.msra.gmra.mrb[0].mxu1 %vm313_vm1, %v6421_v8  ;;  %v4016_v45 = vor.u32 %v4015_v33, %v4011_v44  ;;  %v4037_v23 = vshrl.u32 %v7678_v27, 16  ;;  %v3998_v6 = vsel %vm6606_vm4, %v3993_v19, %v3997_v37  ;;  %v4029_v53 = vrot.slane %v4027_v24, 5  ;;  %v7713_v24 = vld [vmem:[%s6549_s27 + $0xc4] sm:$0xf] }
  0xe7   : > { %5865 = vmatprep.mubr.msk.bf16.mxu1 %vm313_vm1, %v6422_v5  ;;  %6064 = vmatpush3.bf16.msra.mxu1 %v6537_v4  ;;  %v4043_v22 = vshll.u32 %v7683_v58, 16  ;;  %v4048_v0 = vshrl.u32 %v5492_v35, 16  ;;  %v5512_v38 = vcombine.low %v3988_v29, %v3998_v6  ;;  %v4012_v39 = vsel %vm6606_vm4, %v4007_v3, %v4011_v44  ;;  %v5495_v5 = vld [vmem:[%s6549_s27 + $0xc0] sm:$0xf] }
  0xe8   : > { %v4017_v17 = vrot.slane %v4016_v45, 4  ;;  %v4035_v8 = vrot.slane %v4033_v2, 5  ;;  %v4030_v4 = vor.u32 %v4029_v53, %v4026_v10  ;;  %v4039_v56 = vrot.slane %v4037_v23, 4  ;;  %v6424_v29 = vld [vmem:[%s6549_s27 + $0x3c] sm:$0xff]  }
  0xe9   : > { %v4045_v18 = vrot.slane %v4043_v22, 5  ;;  %v4050_v37 = vrot.slane %v4048_v0, 4  ;;  %6014 = vmatmul.mubr.msk.bf16.gmra.mrb[16].mxu0 %vm313_vm1, %v5511_v41  ;;  %v4051_v15 = vshll.u32 %v5492_v35, 16  ;;  %v4057_v44 = vshll.u32 %v7695_v16, 16 }
  0xea   : > { %v4022_v14 = vsel %vm6606_vm4, %v4017_v17, %v4021_v21  ;;  %v4061_v31 = vshrl.u32 %v7695_v16, 16  ;;  %6017 = vmatprep.mubr.msk.bf16.mxu0 %vm313_vm1, %v5512_v38  ;;  %v4031_v33 = vrot.slane %v4030_v4, 4  ;;  %v4040_v19 = vor.u32 %v4039_v56, %v4035_v8  ;;  %v7716_v21 = vld [vmem:[%s6549_s27 + $0xc8] sm:$0x1]  ;;  %v5498_v17 = vld [vmem:[%s6549_s27 + $0xcc] sm:$0xf] }
  0xeb   : > { %v5513_v52 = vcombine.low %v4012_v39, %v4022_v14  ;;  %v4067_v10 = vshll.u32 %v7700_v50, 16  ;;  %v4053_v41 = vrot.slane %v4051_v15, 5  ;;  %v4059_v3 = vrot.slane %v4057_v44, 5  ;;  %v7729_v14 = vld [vmem:[%s6549_s27 + $0xd0] sm:$0xf] }
  0xec   : > { %v4063_v45 = vrot.slane %v4061_v31, 4  ;;  %v4072_v35 = vshrl.u32 %v5495_v5, 16  ;;  %v4036_v2 = vsel %vm6606_vm4, %v4031_v33, %v4035_v8  ;;  %v4041_v23 = vrot.slane %v4040_v19, 4 }
  0xed   : > { %v4069_v6 = vrot.slane %v4067_v10, 5  ;;  %v4075_v53 = vshll.u32 %v5495_v5, 16  ;;  %v4054_v22 = vor.u32 %v4053_v41, %v4050_v37  ;;  %v4081_v39 = vshll.u32 %v7713_v24, 16 }
  0xee   : > { %5866 = vmatmul.mubr.msk.bf16.gmra.mrb[4].mxu1 %vm313_vm1, %v6423_v60  ;;  %v4064_v0 = vor.u32 %v4063_v45, %v4059_v3  ;;  %v4074_v38 = vrot.slane %v4072_v35, 4  ;;  %v4046_v4 = vsel %vm6606_vm4, %v4041_v23, %v4045_v18  ;;  %v4085_v8 = vshrl.u32 %v7713_v24, 16  ;;  %v6425_v18 = vld [vmem:[%s6549_s27 + $0x48] sm:$0xff]   ;;  %v5534_v23 = vld [vmem:[%s6549_s27 + $0x18] sm:$0xe] }
  0xef   : > { %5869 = vmatprep.mubr.msk.bf16.mxu1 %vm313_vm1, %v6424_v29  ;;  %v4077_v56 = vrot.slane %v4075_v53, 5  ;;  %v4091_v5 = vshll.u32 %v7716_v21, 16  ;;  %v5514_v37 = vcombine.low %v4036_v2, %v4046_v4  ;;  %v4055_v60 = vrot.slane %v4054_v22, 4  ;;  %v7732_v29 = vld [vmem:[%s6549_s27 + $0xd4] sm:$0x1] }
  0xf0   : > { %v4065_v15 = vrot.slane %v4064_v0, 4  ;;  %v4083_v44 = vrot.slane %v4081_v39, 5  ;;  %v4087_v33 = vrot.slane %v4085_v8, 4  ;;  %v4096_v10 = vshrl.u32 %v5498_v17, 16  ;;  %v6426_v53 = vld [vmem:[%s6549_s27 + $0x54] sm:$0xff]  }
  0xf1   : > { %v4078_v31 = vor.u32 %v4077_v56, %v4074_v38  ;;  %v4093_v19 = vrot.slane %v4091_v5, 5  ;;  %6018 = vmatmul.mubr.msk.bf16.gmra.mrb[20].mxu0 %vm313_vm1, %v5513_v52  ;;  %v4060_v41 = vsel %vm6606_vm4, %v4055_v60, %v4059_v3  ;;  %v4099_v35 = vshll.u32 %v5498_v17, 16  ;;  %v5535_v8 = vld [vmem:[%s6549_s27 + $0x24] sm:$0xe] }
  0xf2   : > { %v4070_v45 = vsel %vm6606_vm4, %v4065_v15, %v4069_v6  ;;  %v4105_v2 = vshll.u32 %v7729_v14, 16  ;;  %6021 = vmatprep.mubr.msk.bf16.mxu0 %vm313_vm1, %v5514_v37  ;;  %v4088_v38 = vor.u32 %v4087_v33, %v4083_v44  ;;  %v4098_v39 = vrot.slane %v4096_v10, 4  ;;  %v5536_v10 = vld [vmem:[%s6549_s27 + $0x30] sm:$0xe] }
  0xf3   : > { %v5515_v22 = vcombine.low %v4060_v41, %v4070_v45  ;;  %v4079_v0 = vrot.slane %v4078_v31, 4  ;;  %v4101_v52 = vrot.slane %v4099_v35, 5  ;;  %v4109_v56 = vshrl.u32 %v7729_v14, 16 }
  0xf4   : > { %v4107_v4 = vrot.slane %v4105_v2, 5  ;;  %v4115_v3 = vshll.u32 %v7732_v29, 16  ;;  %v4089_v17 = vrot.slane %v4088_v38, 4  ;;  %v5550_v5 = vrot.slane %v5534_v23, 9 }
  0xf5   : > { %v4084_v6 = vsel %vm6606_vm4, %v4079_v0, %v4083_v44  ;;  %v4479_v60 = vrot.slane %v7339_v9, 5  ;;  %v4102_v37 = vor.u32 %v4101_v52, %v4098_v39  ;;  %v4111_v15 = vrot.slane %v4109_v56, 4  ;;  %v5537_v39 = vld [vmem:[%s6549_s27 + $0x3c] sm:$0xe] }
  0xf6   : > { %5870 = vmatmul.mubr.msk.bf16.gmra.mrb[8].mxu1 %vm313_vm1, %v6425_v18  ;;  %v4117_v31 = vrot.slane %v4115_v3, 5  ;;  %v4482_v33 = vrot.slane %v7352_v36, 5  ;;  %v4094_v41 = vsel %vm6606_vm4, %v4089_v17, %v4093_v19  ;;  %v5551_v9 = vrot.slane %v5535_v8, 9  ;;  %v6427_v3 = vld [vmem:[%s6549_s27 + $0x60] sm:$0xff]   ;;  %v5538_v8 = vld [vmem:[%s6549_s27 + $0x48] sm:$0xe] }
  0xf7   : > { %5873 = vmatprep.mubr.msk.bf16.mxu1 %vm313_vm1, %v6426_v53  ;;  %v4480_v44 = vsel %vm6733_vm7, %v5550_v5, %v4479_v60  ;;  %v4481_v45 = vrot.slane %v4479_v60, 4  ;;  %v5516_v18 = vcombine.low %v4084_v6, %v4094_v41  ;;  %v4103_v35 = vrot.slane %v4102_v37, 4  ;;  %v6428_v6 = vld [vmem:[%s6549_s27 + $0x6c] sm:$0xff]  }
  0xf8   : > { %v4112_v2 = vor.u32 %v4111_v15, %v4107_v4  ;;  %v4486_v23 = vrot.slane %v7388_v40, 5  ;;  %v8161_v36 = vshll.u32 %v6926_v12, 16  ;;  %v5552_v19 = vrot.slane %v5536_v10, 9  ;;  %v5539_v15 = vld [vmem:[%s6549_s27 + $0x54] sm:$0xe] }
  0xf9   : > { %v4483_v53 = vsel %vm6733_vm7, %v4481_v45, %v4482_v33  ;;  %v4493_v38 = vrot.slane %v7429_v34, 5  ;;  %v8162_v52 = vor.u32 %v6938_v1, %v6928_v63  ;;  %6022 = vmatmul.mubr.msk.bf16.gmra.mrb[24].mxu0 %vm313_vm1, %v5515_v22  ;;  %v4489_v12 = vrot.slane %v7391_v26, 5 }
  0xfa   : > { %v7761_v0 = vrot.slane %v8161_v36, 5  ;;  %v4113_v40 = vrot.slane %v4112_v2, 4  ;;  %6025 = vmatprep.mubr.msk.bf16.mxu0 %vm313_vm1, %v5516_v18  ;;  %v4108_v34 = vsel %vm6606_vm4, %v4103_v35, %v4107_v4  ;;  %v5567_v17 = vcombine.low %v4480_v44, %v4483_v53  ;;  %v5266_v44 = vld [vmem:[%s6549_s27 + $0x6c] sm:$0xf] }
  0xfb   : > { %v7770_v56 = vrot.slane %v8162_v52, 4  ;;  %v7782_v1 = vsel %vm6733_vm7, %v5551_v9, %v4486_v23  ;;  %v4488_v5 = vrot.slane %v4486_v23, 4  ;;  %v5553_v60 = vrot.slane %v5537_v39, 9  ;;  %v6429_v39 = vld [vmem:[%s6549_s27 + $0x78] sm:$0xff]  }
  0xfc   : > { %v4118_v22 = vsel %vm6606_vm4, %v4113_v40, %v4117_v31  ;;  %v4500_v26 = vrot.slane %v7455_v51, 5  ;;  %v4503_v37 = vrot.slane %v7466_v43, 5  ;;  %v7791_v33 = vsel %vm6733_vm7, %v5552_v19, %v4493_v38  ;;  %v5269_v19 = vld [vmem:[%s6549_s27 + $0x78] sm:$0xf]  ;;  %v6446_v40 = vld [vmem:[%s6549_s27 + $0x70] sm:$0xf] }
  0xfd   : > { %v4495_v4 = vrot.slane %v4493_v38, 4  ;;  %v4496_v10 = vrot.slane %v7441_v25, 5  ;;  %v5554_v41 = vrot.slane %v5538_v8, 9  ;;  %v5517_v45 = vcombine.low %v4108_v34, %v4118_v22  ;;  %v6430_v8 = vld [vmem:[%s6549_s27 + $0x84] sm:$0xff]  }
  0xfe   : > { %5874 = vmatmul.mubr.msk.bf16.gmra.mrb[12].mxu1 %vm313_vm1, %v6427_v3  ;;  %v4490_v31 = vsel %vm6733_vm7, %v4488_v5, %v4489_v12  ;;  %v7800_v51 = vsel %vm6733_vm7, %v5553_v60, %v4500_v26  ;;  %v4502_v43 = vrot.slane %v4500_v26, 4  ;;  %v4507_v9 = vrot.slane %v7505_v61, 5  ;;  %v5540_v60 = vld [vmem:[%s6549_s27 + $0x60] sm:$0xe] }
  0xff   : > { %5877 = vmatprep.mubr.msk.bf16.mxu1 %vm313_vm1, %v6428_v6  ;;  %v4510_v25 = vrot.slane %v7508_v55, 5  ;;  %v5555_v18 = vrot.slane %v5539_v15, 9  ;;  %v4514_v35 = vrot.slane %v7527_v59, 5  ;;  %v4517_v23 = vrot.slane %v7534_v48, 5 }
 0x100   : > { %v7808_v2 = vsel %vm6733_vm7, %v4502_v43, %v4503_v37  ;;  %v2370_v36 = vshrl.u32 %v5266_v44, 16  ;;  %v2373_v53 = vshll.u32 %v5266_v44, 16  ;;  %v4497_v38 = vsel %vm6733_vm7, %v4495_v4, %v4496_v10 }
 0x101   : > { %v5570_v61 = vcombine.low %v7800_v51, %v7808_v2  ;;  %v7818_v55 = vsel %vm6733_vm7, %v5554_v41, %v4507_v9  ;;  %v4509_v59 = vrot.slane %v4507_v9, 4  ;;  %6026 = vmatmul.mubr.msk.bf16.gmra.mrb[28].mxu0 %vm313_vm1, %v5517_v45  ;;  %v7824_v48 = vsel %vm6733_vm7, %v5555_v18, %v4514_v35  ;;  %v6447_v45 = vld [vmem:[%s6549_s27 + $0x74] sm:$0x1] }
 0x102   : > { %v4516_v52 = vrot.slane %v4514_v35, 4  ;;  %v2372_v3 = vrot.slane %v2370_v36, 4  ;;  %v2379_v12 = vshll.u32 %v6446_v40, 16  ;;  %6031 = vmatprep.mubr.msk.bf16.mxu0 %vm313_vm1, %v5567_v17  ;;  %v2375_v34 = vrot.slane %v2373_v53, 5  ;;  %v5541_v17 = vld [vmem:[%s6549_s27 + $0x6c] sm:$0xe] }
 0x103   : > { %v7831_v6 = vsel %vm6733_vm7, %v4509_v59, %v4510_v25  ;;  %v2383_v5 = vshrl.u32 %v6446_v40, 16  ;;  %v2394_v22 = vshrl.u32 %v5269_v19, 16  ;;  %v5568_v26 = vcombine.low %v7782_v1, %v4490_v31  ;;  %v5272_v25 = vld [vmem:[%s6549_s27 + $0x84] sm:$0xf] }
 0x104   : > { %v5569_v37 = vcombine.low %v7791_v33, %v4497_v38  ;;  %v5571_v15 = vcombine.low %v7818_v55, %v7831_v6  ;;  %v7840_v4 = vsel %vm6733_vm7, %v4516_v52, %v4517_v23  ;;  %v7845_v41 = vrot.slane %v2379_v12, 5 }
 0x105   : > { %v5572_v10 = vcombine.low %v7824_v48, %v7840_v4  ;;  %v2385_v44 = vrot.slane %v2383_v5, 4  ;;  %v2389_v43 = vshll.u32 %v6447_v45, 16  ;;  %v2396_v1 = vrot.slane %v2394_v22, 4  ;;  %v5275_v22 = vld [vmem:[%s6549_s27 + $0x90] sm:$0xf] }
 0x106   : > { %5878 = vmatmul.mubr.msk.bf16.gmra.mrb[16].mxu1 %vm313_vm1, %v6429_v39  ;;  %v2397_v33 = vshll.u32 %v5269_v19, 16  ;;  %v2416_v31 = vsel %vm6606_vm4, %v7770_v56, %v7761_v0  ;;  %v5556_v9 = vrot.slane %v5540_v60, 9  ;;  %v2376_v18 = vor.u32 %v2375_v34, %v2372_v3  ;;  %v6432_v3 = vld [vmem:[%s6549_s27 + $0x9c] sm:$0xff]   ;;  %v6448_v34 = vld [vmem:[%s6549_s27 + $0x88] sm:$0xf] }
 0x107   : > { %5881 = vmatprep.mubr.msk.bf16.mxu1 %vm313_vm1, %v6430_v8  ;;  %v4521_v35 = vrot.slane %v7557_v13, 5  ;;  %v4524_v23 = vrot.slane %v7561_v30, 5  ;;  %v5557_v36 = vrot.slane %v5541_v17, 9  ;;  %v4528_v19 = vrot.slane %v7578_v62, 5  ;;  %v6431_v13 = vld [vmem:[%s6549_s27 + $0x90] sm:$0xff]  }
 0x108   : > { %v2399_v53 = vrot.slane %v2397_v33, 5  ;;  %v4531_v38 = vrot.slane %v7589_v57, 5  ;;  %v2386_v59 = vor.u32 %v2385_v44, %v7845_v41  ;;  %v2418_v39 = vshrl.u32 %v5272_v25, 16 }
 0x109   : > { %v7862_v0 = vsel %vm6733_vm7, %v5556_v9, %v4521_v35  ;;  %v4523_v56 = vrot.slane %v4521_v35, 4  ;;  %6032 = vmatmul.mubr.msk.bf16.vlgmr.msra.gmra.mrb[0].mxu0 %vm313_vm1, %v5568_v26  ;;  %v7868_v52 = vsel %vm6733_vm7, %v5557_v36, %v4528_v19  ;;  %v4530_v62 = vrot.slane %v4528_v19, 4  ;;  %v6449_v36 = vld [vmem:[%s6549_s27 + $0x8c] sm:$0x1]  ;;  %v6450_v19 = vld [vmem:[%s6549_s27 + $0x94] sm:$0xf] }
 0x10a   : > { %v2400_v30 = vor.u32 %v2399_v53, %v2396_v1  ;;  %v2421_v57 = vshll.u32 %v5272_v25, 16  ;;  %6035 = vmatprep.mubr.msk.bf16.mxu0 %vm313_vm1, %v5569_v37  ;;  %v7872_v40 = vrot.slane %v2376_v18, 4  ;;  %v7874_v12 = vrot.slane %v2389_v43, 5 }
 0x10b   : > { %v7878_v8 = vsel %vm6733_vm7, %v4523_v56, %v4524_v23  ;;  %v2427_v5 = vshll.u32 %v6448_v34, 16  ;;  %v7886_v17 = vsel %vm6733_vm7, %v4530_v62, %v4531_v38  ;;  %v2420_v37 = vrot.slane %v2418_v39, 4  ;;  %v5542_v56 = vld [vmem:[%s6549_s27 + $0x78] sm:$0xe] }
 0x10c   : > { %v2401_v60 = vrot.slane %v2400_v30, 4  ;;  %v5573_v26 = vcombine.low %v7862_v0, %v7878_v8  ;;  %v5574_v44 = vcombine.low %v7868_v52, %v7886_v17  ;;  %v2423_v45 = vrot.slane %v2421_v57, 5  ;;  %v6451_v57 = vld [vmem:[%s6549_s27 + $0x98] sm:$0x1]  ;;  %v6454_v0 = vld [vmem:[%s6549_s27 + $0xa4] sm:$0x1] }
 0x10d   : > { %v7890_v43 = vrot.slane %v2427_v5, 5  ;;  %v2431_v1 = vshrl.u32 %v6448_v34, 16  ;;  %v2387_v33 = vrot.slane %v2386_v59, 4  ;;  %v2442_v25 = vshrl.u32 %v5275_v22, 16 }
 0x10e   : > { %5882 = vmatmul.mubr.msk.bf16.gmra.mrb[20].mxu1 %vm313_vm1, %v6431_v13  ;;  %v2406_v9 = vsel %vm6606_vm4, %v2401_v60, %v6928_v63  ;;  %v2445_v18 = vshll.u32 %v5275_v22, 16  ;;  %v2437_v53 = vshll.u32 %v6449_v36, 16  ;;  %v2451_v38 = vshll.u32 %v6450_v19, 16 }
 0x10f   : > { %5885 = vmatprep.mubr.msk.bf16.mxu1 %vm313_vm1, %v6432_v3  ;;  %v7897_v35 = vcombine.low %v2406_v9, %v2416_v31  ;;  %v2433_v23 = vrot.slane %v2431_v1, 4  ;;  %v2424_v59 = vor.u32 %v2423_v45, %v2420_v37  ;;  %v2444_v39 = vrot.slane %v2442_v25, 4  ;;  %v6433_v31 = vld [vmem:[%s6549_s27 + $0xa8] sm:$0xff]   ;;  %v5543_v37 = vld [vmem:[%s6549_s27 + $0x84] sm:$0xe]  ;;  %v6434_v45 = vld [vmem:[%s6549_s27 + $0xb4] sm:$0xff]  }
 0x110   : > { %v2447_v13 = vrot.slane %v2445_v18, 5  ;;  %v2455_v63 = vshrl.u32 %v6450_v19, 16  ;;  %v7903_v62 = vrot.slane %v2451_v38, 5  ;;  %v2461_v3 = vshll.u32 %v6451_v57, 16 }
 0x111   : > { %v2434_v30 = vor.u32 %v2433_v23, %v7890_v43  ;;  %6036 = vmatmul.mubr.msk.bf16.gmra.mrb[4].mxu0 %vm313_vm1, %v5570_v61  ;;  %v5558_v22 = vrot.slane %v5542_v56, 9  ;;  %v4535_v60 = vrot.slane %v7599_v46, 5  ;;  %v2382_v51 = vsel %vm6606_vm4, %v7872_v40, %v7845_v41  ;;  %v6452_v56 = vld [vmem:[%s6549_s27 + $0xa0] sm:$0xf] }
 0x112   : > { %v2448_v34 = vor.u32 %v2447_v13, %v2444_v39  ;;  %v2457_v5 = vrot.slane %v2455_v63, 4  ;;  %6039 = vmatprep.mubr.msk.bf16.mxu0 %vm313_vm1, %v5571_v15  ;;  %v2392_v2 = vsel %vm6606_vm4, %v2387_v33, %v7874_v12  ;;  %v2439_v61 = vrot.slane %v2437_v53, 5  ;;  %v5278_v15 = vld [vmem:[%s6549_s27 + $0x9c] sm:$0xf]  ;;  %v5281_v13 = vld [vmem:[%s6549_s27 + $0xa8] sm:$0xf] }
 0x113   : > { %v4538_v1 = vrot.slane %v7607_v32, 5  ;;  %v2425_v46 = vrot.slane %v2424_v59, 4  ;;  %v7929_v55 = vsel %vm6733_vm7, %v5558_v22, %v4535_v60  ;;  %v4537_v6 = vrot.slane %v4535_v60, 4 }
 0x114   : > { %v2458_v9 = vor.u32 %v2457_v5, %v7903_v62  ;;  %v2435_v25 = vrot.slane %v2434_v30, 4  ;;  %v5559_v18 = vrot.slane %v5543_v37, 9  ;;  %v4542_v41 = vrot.slane %v7615_v7, 5  ;;  %v5544_v37 = vld [vmem:[%s6549_s27 + $0x90] sm:$0xe] }
 0x115   : > { %v4545_v40 = vrot.slane %v7629_v54, 5  ;;  %v2449_v32 = vrot.slane %v2448_v34, 4  ;;  %v2463_v33 = vrot.slane %v2461_v3, 5  ;;  %v7937_v23 = vsel %vm6733_vm7, %v4537_v6, %v4538_v1  ;;  %v5545_v1 = vld [vmem:[%s6549_s27 + $0x9c] sm:$0xe] }
 0x116   : > { %5886 = vmatmul.mubr.msk.bf16.gmra.mrb[24].mxu1 %vm313_vm1, %v6433_v31  ;;  %v2459_v12 = vrot.slane %v2458_v9, 4  ;;  %v5575_v36 = vcombine.low %v7929_v55, %v7937_v23  ;;  %v7944_v7 = vsel %vm6733_vm7, %v5559_v18, %v4542_v41  ;;  %v4544_v54 = vrot.slane %v4542_v41, 4  ;;  %v6435_v31 = vld [vmem:[%s6549_s27 + $0xc0] sm:$0xff]  }
 0x117   : > { %5889 = vmatprep.mubr.msk.bf16.mxu1 %vm313_vm1, %v6434_v45  ;;  %v2466_v53 = vshrl.u32 %v5278_v15, 16  ;;  %v5299_v19 = vcombine.low %v2382_v51, %v2392_v2  ;;  %v2469_v38 = vshll.u32 %v5278_v15, 16  ;;  %v2475_v59 = vshll.u32 %v6452_v56, 16  ;;  %v6453_v51 = vld [vmem:[%s6549_s27 + $0xac] sm:$0xf] }
 0x118   : > { %v2479_v39 = vshrl.u32 %v6452_v56, 16  ;;  %v2430_v63 = vsel %vm6606_vm4, %v2425_v46, %v7890_v43  ;;  %v2440_v30 = vsel %vm6606_vm4, %v2435_v25, %v2439_v61  ;;  %v7955_v57 = vsel %vm6733_vm7, %v4544_v54, %v4545_v40  ;;  %v5284_v54 = vld [vmem:[%s6549_s27 + $0xb4] sm:$0xf] }
 0x119   : > { %v2468_v3 = vrot.slane %v2466_v53, 4  ;;  %6040 = vmatmul.mubr.msk.bf16.gmra.mrb[8].mxu0 %vm313_vm1, %v5572_v10  ;;  %v5576_v34 = vcombine.low %v7944_v7, %v7955_v57  ;;  %v2471_v43 = vrot.slane %v2469_v38, 5  ;;  %v7964_v5 = vrot.slane %v2475_v59, 5 }
 0x11a   : > { %v2481_v22 = vrot.slane %v2479_v39, 4  ;;  %6043 = vmatprep.mubr.msk.bf16.mxu0 %vm313_vm1, %v5573_v26  ;;  %v2454_v48 = vsel %vm6606_vm4, %v2449_v32, %v7903_v62  ;;  %v2464_v4 = vsel %vm6606_vm4, %v2459_v12, %v2463_v33  ;;  %v2490_v10 = vshrl.u32 %v5281_v13, 16  ;;  %v6455_v26 = vld [vmem:[%s6549_s27 + $0xb0] sm:$0x1] }
 0x11b   : > { %v2493_v60 = vshll.u32 %v5281_v13, 16  ;;  %v2472_v45 = vor.u32 %v2471_v43, %v2468_v3  ;;  %v2499_v2 = vshll.u32 %v6453_v51, 16  ;;  %v2503_v61 = vshrl.u32 %v6453_v51, 16 }
 0x11c   : > { %v2482_v46 = vor.u32 %v2481_v22, %v7964_v5  ;;  %v2485_v8 = vshll.u32 %v6454_v0, 16  ;;  %v2509_v9 = vshll.u32 %v6455_v26, 16  ;;  %v5301_v62 = vcombine.low %v2430_v63, %v2440_v30 }
 0x11d   : > { %v7982_v55 = vcombine.low %v2454_v48, %v2464_v4  ;;  %v2492_v6 = vrot.slane %v2490_v10, 4  ;;  %v5560_v15 = vrot.slane %v5544_v37, 9  ;;  %v2495_v25 = vrot.slane %v2493_v60, 5  ;;  %v6457_v10 = vld [vmem:[%s6549_s27 + $0xbc] sm:$0x1] }
 0x11e   : > { %5890 = vmatmul.mubr.msk.bf16.gmra.mrb[28].mxu1 %vm313_vm1, %v6435_v31  ;;  %v4549_v18 = vrot.slane %v7636_v28, 5  ;;  %v4552_v41 = vrot.slane %v7646_v49, 5  ;;  %v5561_v40 = vrot.slane %v5545_v1, 9  ;;  %v2473_v32 = vrot.slane %v2472_v45, 4 }
 0x11f   : > { %5911 = vmatprep.mubr.msk.bf16.mxu1 %vm313_vm1, %v5299_v19  ;;  %v7987_v12 = vrot.slane %v2499_v2, 5  ;;  %v2505_v33 = vrot.slane %v2503_v61, 4  ;;  %v4556_v23 = vrot.slane %v7653_v20, 5  ;;  %v2483_v53 = vrot.slane %v2482_v46, 4  ;;  %v6458_v2 = vld [vmem:[%s6549_s27 + $0xc4] sm:$0xf] }
 0x120   : > { %v2487_v38 = vrot.slane %v2485_v8, 5  ;;  %v7991_v56 = vrot.slane %v2509_v9, 5  ;;  %v4551_v19 = vrot.slane %v4549_v18, 4  ;;  %v4550_v28 = vsel %vm6733_vm7, %v5560_v15, %v4549_v18  ;;  %v5546_v46 = vld [vmem:[%s6549_s27 + $0xa8] sm:$0xe] }
 0x121   : > { %6044 = vmatmul.mubr.msk.bf16.gmra.mrb[12].mxu0 %vm313_vm1, %v5574_v44  ;;  %v8001_v49 = vsel %vm6733_vm7, %v5561_v40, %v4556_v23  ;;  %v4558_v20 = vrot.slane %v4556_v23, 4  ;;  %v4559_v59 = vrot.slane %v7665_v11, 5  ;;  %v2496_v39 = vor.u32 %v2495_v25, %v2492_v6  ;;  %v5287_v44 = vld [vmem:[%s6549_s27 + $0xc0] sm:$0xf]  ;;  %v6456_v11 = vld [vmem:[%s6549_s27 + $0xb8] sm:$0xf] }
 0x122   : > { %6047 = vmatprep.mubr.msk.bf16.mxu0 %vm313_vm1, %v5575_v36  ;;  %v4553_v13 = vsel %vm6733_vm7, %v4551_v19, %v4552_v41  ;;  %v2514_v52 = vshrl.u32 %v5284_v54, 16  ;;  %v2517_v17 = vshll.u32 %v5284_v54, 16  ;;  %v2478_v63 = vsel %vm6606_vm4, %v2473_v32, %v7964_v5 }
 0x123   : > { %v2506_v30 = vor.u32 %v2505_v33, %v7987_v12  ;;  %v8014_v3 = vsel %vm6733_vm7, %v4558_v20, %v4559_v59  ;;  %v2523_v36 = vshll.u32 %v6456_v11, 16  ;;  %v5577_v31 = vcombine.low %v4550_v28, %v4553_v13  ;;  %v5548_v20 = vld [vmem:[%s6549_s27 + $0xc0] sm:$0xe] }
 0x124   : > { %v5578_v43 = vcombine.low %v8001_v49, %v8014_v3  ;;  %v2516_v22 = vrot.slane %v2514_v52, 4  ;;  %v2519_v48 = vrot.slane %v2517_v17, 5  ;;  %v2527_v4 = vshrl.u32 %v6456_v11, 16  ;;  %v5549_v52 = vld [vmem:[%s6549_s27 + $0xcc] sm:$0xe] }
 0x125   : > { %v2525_v5 = vrot.slane %v2523_v36, 5  ;;  %v2533_v60 = vshll.u32 %v6457_v10, 16  ;;  %v2538_v37 = vshrl.u32 %v5287_v44, 16  ;;  %v2541_v51 = vshll.u32 %v5287_v44, 16 }
 0x126   : > { %5912 = vmatmul.mubr.msk.bf16.vlgmr.msra.gmra.mrb[16].mxu1 %vm313_vm1, %v7897_v35  ;;  %v2520_v45 = vor.u32 %v2519_v48, %v2516_v22  ;;  %v2547_v61 = vshll.u32 %v6458_v2, 16  ;;  %v2551_v1 = vshrl.u32 %v6458_v2, 16  ;;  %v2488_v0 = vsel %vm6606_vm4, %v2483_v53, %v2487_v38  ;;  %v6459_v53 = vld [vmem:[%s6549_s27 + $0xc8] sm:$0x1] }
 0x127   : > { %5915 = vmatprep.mubr.msk.bf16.mxu1 %vm313_vm1, %v5301_v62  ;;  %v2497_v8 = vrot.slane %v2496_v39, 4  ;;  %v2507_v26 = vrot.slane %v2506_v30, 4  ;;  %v2529_v35 = vrot.slane %v2527_v4, 4  ;;  %v2540_v6 = vrot.slane %v2538_v37, 4 }
 0x128   : > { %v2521_v9 = vrot.slane %v2520_v45, 4  ;;  %v2543_v15 = vrot.slane %v2541_v51, 5  ;;  %v2549_v25 = vrot.slane %v2547_v61, 5  ;;  %v2553_v18 = vrot.slane %v2551_v1, 4 }
 0x129   : > { %6048 = vmatmul.mubr.msk.bf16.gmra.mrb[16].mxu0 %vm313_vm1, %v5576_v34  ;;  %v2530_v62 = vor.u32 %v2529_v35, %v2525_v5  ;;  %v5562_v41 = vrot.slane %v5546_v46, 9  ;;  %v4563_v40 = vrot.slane %v7678_v27, 5  ;;  %v5303_v32 = vcombine.low %v2478_v63, %v2488_v0  ;;  %v5547_v34 = vld [vmem:[%s6549_s27 + $0xb4] sm:$0xe] }
 0x12a   : > { %6051 = vmatprep.mubr.msk.bf16.mxu0 %vm313_vm1, %v5577_v31  ;;  %v2535_v33 = vrot.slane %v2533_v60, 5  ;;  %v4566_v23 = vrot.slane %v7683_v58, 5  ;;  %v2557_v38 = vshll.u32 %v6459_v53, 16  ;;  %v2502_v19 = vsel %vm6606_vm4, %v2497_v8, %v7987_v12 }
 0x12b   : > { %v2531_v54 = vrot.slane %v2530_v62, 4  ;;  %v4564_v7 = vsel %vm6733_vm7, %v5562_v41, %v4563_v40  ;;  %v4565_v57 = vrot.slane %v4563_v40, 4  ;;  %v2512_v27 = vsel %vm6606_vm4, %v2507_v26, %v7991_v56 }
 0x12c   : > { %v2526_v58 = vsel %vm6606_vm4, %v2521_v9, %v2525_v5  ;;  %v4570_v28 = vrot.slane %v7695_v16, 5  ;;  %v2544_v59 = vor.u32 %v2543_v15, %v2540_v6  ;;  %v2554_v39 = vor.u32 %v2553_v18, %v2549_v25 }
 0x12d   : > { %v4567_v13 = vsel %vm6733_vm7, %v4565_v57, %v4566_v23  ;;  %v4577_v12 = vrot.slane %v7713_v24, 5  ;;  %v2536_v56 = vsel %vm6606_vm4, %v2531_v54, %v2535_v33  ;;  %v5563_v44 = vrot.slane %v5547_v34, 9 }
 0x12e   : > { %5916 = vmatmul.mubr.msk.bf16.gmra.mrb[20].mxu1 %vm313_vm1, %v7982_v55  ;;  %v5579_v17 = vcombine.low %v4564_v7, %v4567_v13  ;;  %v4573_v16 = vrot.slane %v7700_v50, 5  ;;  %v5304_v63 = vcombine.low %v2502_v19, %v2512_v27  ;;  %v2559_v30 = vrot.slane %v2557_v38, 5 }
 0x12f   : > { %5919 = vmatprep.mubr.msk.bf16.mxu1 %vm313_vm1, %v5303_v32  ;;  %v4572_v55 = vrot.slane %v4570_v28, 4  ;;  %v5564_v11 = vrot.slane %v5548_v20, 9  ;;  %v4579_v36 = vrot.slane %v4577_v12, 4  ;;  %v4580_v31 = vrot.slane %v7716_v21, 5  ;;  %v8091_v32 = vld [vmem:[%s8155_s2] ss:$0 sm:$0xff] }
 0x130   : > { %v5565_v22 = vrot.slane %v5549_v52, 9  ;;  %v4584_v24 = vrot.slane %v7729_v14, 5  ;;  %v5305_v48 = vcombine.low %v2526_v58, %v2536_v56  ;;  %v2545_v5 = vrot.slane %v2544_v59, 4 }
 0x131   : > { %6052 = vmatmul.mubr.msk.bf16.gmra.mrb[20].mxu0 %vm313_vm1, %v5578_v43  ;;  %v2555_v4 = vrot.slane %v2554_v39, 4  ;;  %v4587_v50 = vrot.slane %v7732_v29, 5  ;;  %v4571_v10 = vsel %vm6733_vm7, %v5563_v44, %v4570_v28  ;;  %v4574_v21 = vsel %vm6733_vm7, %v4572_v55, %v4573_v16 }
 0x132   : > { %6055 = vmatprep.mubr.msk.bf16.mxu0 %vm313_vm1, %v5579_v17  ;;  %v4585_v14 = vsel %vm6733_vm7, %v5565_v22, %v4584_v24  ;;  %v4586_v60 = vrot.slane %v4584_v24, 4  ;;  %v4578_v49 = vsel %vm6733_vm7, %v5564_v11, %v4577_v12  ;;  %v4581_v3 = vsel %vm6733_vm7, %v4579_v36, %v4580_v31 }
 0x133   : > { %v5580_v43 = vcombine.low %v4571_v10, %v4574_v21  ;;  %v2550_v45 = vsel %vm6606_vm4, %v2545_v5, %v2549_v25  ;;  %v2560_v51 = vsel %vm6606_vm4, %v2555_v4, %v2559_v30  ;;  %v5581_v2 = vcombine.low %v4578_v49, %v4581_v3 }
 0x134   : > { %v4588_v29 = vsel %vm6733_vm7, %v4586_v60, %v4587_v50  ;;  %v5306_v61 = vcombine.low %v2550_v45, %v2560_v51 }
 0x135   : > { %v5582_v37 = vcombine.low %v4585_v14, %v4588_v29 }
 0x136   : > { %5920 = vmatmul.mubr.msk.bf16.gmra.mrb[24].mxu1 %vm313_vm1, %v5304_v63 }
 0x137   : > { %5923 = vmatprep.mubr.msk.bf16.mxu1 %vm313_vm1, %v5305_v48 }
 0x139   : > { %6056 = vmatmul.mubr.msk.bf16.gmra.mrb[24].mxu0 %vm313_vm1, %v5580_v43 }
 0x13a   : > { %6059 = vmatprep.mubr.msk.bf16.mxu0 %vm313_vm1, %v5581_v2 }
 0x13e   : > { %5924 = vmatmul.mubr.msk.bf16.gmra.mrb[28].mxu1 %vm313_vm1, %v5306_v61 }
 0x141   : > { %6060 = vmatmul.mubr.msk.bf16.gmra.mrb[28].mxu0 %vm313_vm1, %v5582_v37 }
 0x1b9   : > { %v5863_v47 = vpop.f32.mrb[0].mxu1 }
 0x1ba   : > { %v1970_v1 = vpop.f32.mrb[1].mxu1  ;;  %v6065_v33 = vadd.f32 %v5863_v47, %v8091_v32 }
 0x1bb   : > { %v5864_v46 = vpop.f32.mrb[2].mxu1  ;;  %v6067_v23 = vadd.f32 %v8091_v32, %v1970_v1 }
 0x1bc   : > { %v1973_v0 = vpop.f32.mrb[3].mxu1  ;;  %v6069_v53 = vadd.f32 %v5864_v46, %v8091_v32 }
 0x1bd   : > { %v6071_v57 = vadd.f32 %v8091_v32, %v1973_v0 }
 0x1c1   : > { %v5867_v8 = vpop.f32.mrb[4].mxu1 }
 0x1c2   : > { %v1986_v26 = vpop.f32.mrb[5].mxu1  ;;  %v6073_v20 = vadd.f32 %v5867_v8, %v8091_v32 }
 0x1c3   : > { %v5868_v35 = vpop.f32.mrb[6].mxu1  ;;  %v6075_v59 = vadd.f32 %v8091_v32, %v1986_v26 }
 0x1c4   : > { %v1989_v9 = vpop.f32.mrb[7].mxu1  ;;  %v6077_v13 = vadd.f32 %v5868_v35, %v8091_v32 }
 0x1c5   : > { %v6079_v56 = vadd.f32 %v8091_v32, %v1989_v9 }
 0x1c9   : > { %v5871_v42 = vpop.f32.mrb[8].mxu1 }
 0x1ca   : > { %v2002_v6 = vpop.f32.mrb[9].mxu1  ;;  %v6081_v55 = vadd.f32 %v5871_v42, %v8091_v32 }
 0x1cb   : > { %v5872_v15 = vpop.f32.mrb[10].mxu1  ;;  %v6083_v11 = vadd.f32 %v8091_v32, %v2002_v6 }
 0x1cc   : > { %v2005_v25 = vpop.f32.mrb[11].mxu1  ;;  %v6085_v31 = vadd.f32 %v5872_v15, %v8091_v32 }
 0x1cd   : > { %v6087_v48 = vadd.f32 %v8091_v32, %v2005_v25 }
 0x1d1   : > { %v5875_v62 = vpop.f32.mrb[12].mxu1 }
 0x1d2   : > { %v2018_v18 = vpop.f32.mrb[13].mxu1  ;;  %v6089_v14 = vadd.f32 %v5875_v62, %v8091_v32 }
 0x1d3   : > { %v5876_v41 = vpop.f32.mrb[14].mxu1  ;;  %v6091_v60 = vadd.f32 %v8091_v32, %v2018_v18 }
 0x1d4   : > { %v2021_v40 = vpop.f32.mrb[15].mxu1  ;;  %v6093_v3 = vadd.f32 %v5876_v41, %v8091_v32 }
 0x1d5   : > { %v6095_v37 = vadd.f32 %v8091_v32, %v2021_v40 }
 0x1dc   : > { %v6033_v54 = vpop.f32.mrb[0].mxu0 }
 0x1dd   : > { %v6066_v38 = vadd.f32 %v6065_v33, %v6033_v54  ;;  %v4724_v7 = vpop.f32.mrb[1].mxu0 }
 0x1de   : > { %v6034_v34 = vpop.f32.mrb[2].mxu0  ;;  %v6068_v19 = vadd.f32 %v6067_v23, %v4724_v7 }
 0x1df   : > { %v6070_v27 = vadd.f32 %v6069_v53, %v6034_v34  ;;  %v4727_v58 = vpop.f32.mrb[3].mxu0 }
 0x1e0   : > { %v6072_v28 = vadd.f32 %v6071_v57, %v4727_v58  ;;  %4883 = vxpose.xlu0.b32.start [1/16] (narrow) %v6068_v19, 16 }
 0x1e4   : > { %v6037_v39 = vpop.f32.mrb[4].mxu0  ;;  %4884 = vxpose.xlu0.b32.cont [2/16] (narrow) %v6072_v28, 16 }
 0x1e5   : > { %v6074_v12 = vadd.f32 %v6073_v20, %v6037_v39  ;;  %v4740_v52 = vpop.f32.mrb[5].mxu0 }
 0x1e6   : > { %v6076_v17 = vadd.f32 %v6075_v59, %v4740_v52  ;;  %v6038_v44 = vpop.f32.mrb[6].mxu0 }
 0x1e7   : > { %v6078_v16 = vadd.f32 %v6077_v13, %v6038_v44  ;;  %v4743_v63 = vpop.f32.mrb[7].mxu0 }
 0x1e8   : > { %v6080_v30 = vadd.f32 %v6079_v56, %v4743_v63  ;;  %4885 = vxpose.xlu0.b32.cont [3/16] (narrow) %v6066_v38, 16 }
 0x1ec   : > { %v6041_v36 = vpop.f32.mrb[8].mxu0  ;;  %4886 = vxpose.xlu0.b32.cont [4/16] (narrow) %v6070_v27, 16 }
 0x1ed   : > { %v6082_v22 = vadd.f32 %v6081_v55, %v6041_v36  ;;  %v4756_v24 = vpop.f32.mrb[9].mxu0 }
 0x1ee   : > { %v6084_v5 = vadd.f32 %v6083_v11, %v4756_v24  ;;  %v6042_v4 = vpop.f32.mrb[10].mxu0 }
 0x1ef   : > { %v8105_v50 = vadd.f32 %v6085_v31, %v6042_v4  ;;  %v4759_v10 = vpop.f32.mrb[11].mxu0 }
 0x1f0   : > { %v6088_v21 = vadd.f32 %v6087_v48, %v4759_v10  ;;  %4887 = vxpose.xlu0.b32.cont [5/16] (narrow) %v6076_v17, 16 }
 0x1f4   : > { %v6045_v49 = vpop.f32.mrb[12].mxu0  ;;  %4888 = vxpose.xlu0.b32.cont [6/16] (narrow) %v6080_v30, 16 }
 0x1f5   : > { %v8110_v29 = vadd.f32 %v6089_v14, %v6045_v49  ;;  %v4772_v43 = vpop.f32.mrb[13].mxu0 }
 0x1f6   : > { %v8113_v45 = vadd.f32 %v6091_v60, %v4772_v43  ;;  %v6046_v51 = vpop.f32.mrb[14].mxu0 }
 0x1f7   : > { %v8115_v2 = vadd.f32 %v6093_v3, %v6046_v51  ;;  %v4775_v61 = vpop.f32.mrb[15].mxu0 }
 0x1f8   : > { %v8117_v1 = vadd.f32 %v6095_v37, %v4775_v61  ;;  %4889 = vxpose.xlu0.b32.cont [7/16] (narrow) %v6074_v12, 16 }
 0x1f9   : > { %v5913_v47 = vpop.f32.mrb[16].mxu1 }
 0x1fa   : > { %v2760_v46 = vpop.f32.mrb[17].mxu1  ;;  %v6097_v8 = vadd.f32 %v5913_v47, %v8091_v32 }
 0x1fb   : > { %v5914_v0 = vpop.f32.mrb[18].mxu1  ;;  %v6099_v35 = vadd.f32 %v8091_v32, %v2760_v46 }
 0x1fc   : > { %v2763_v26 = vpop.f32.mrb[19].mxu1  ;;  %v6049_v9 = vpop.f32.mrb[16].mxu0  ;;  %4890 = vxpose.xlu0.b32.cont [8/16] (narrow) %v6078_v16, 16  ;;  %v6101_v42 = vadd.f32 %v5914_v0, %v8091_v32 }
 0x1fd   : > { %v6098_v6 = vadd.f32 %v6097_v8, %v6049_v9  ;;  %v4788_v15 = vpop.f32.mrb[17].mxu0  ;;  %v6103_v25 = vadd.f32 %v8091_v32, %v2763_v26 }
 0x1fe   : > { %v6050_v62 = vpop.f32.mrb[18].mxu0  ;;  %v6100_v18 = vadd.f32 %v6099_v35, %v4788_v15 }
 0x1ff   : > { %v6102_v41 = vadd.f32 %v6101_v42, %v6050_v62  ;;  %v4791_v40 = vpop.f32.mrb[19].mxu0 }
 0x200   : > { %v6104_v23 = vadd.f32 %v6103_v25, %v4791_v40  ;;  %4891 = vxpose.xlu0.b32.cont [9/16] (narrow) %v6084_v5, 16  ;;  %4915 = vxpose.xlu1.b32.start [1/16] (narrow) %v6100_v18, 16 }
 0x201   : > { %v5917_v33 = vpop.f32.mrb[20].mxu1 }
 0x202   : > { %v2776_v54 = vpop.f32.mrb[21].mxu1  ;;  %v6105_v38 = vadd.f32 %v5917_v33, %v8091_v32 }
 0x203   : > { %v5918_v53 = vpop.f32.mrb[22].mxu1  ;;  %v6107_v57 = vadd.f32 %v8091_v32, %v2776_v54 }
 0x204   : > { %v2779_v7 = vpop.f32.mrb[23].mxu1  ;;  %v6053_v34 = vpop.f32.mrb[20].mxu0  ;;  %4892 = vxpose.xlu0.b32.cont [10/16] (narrow) %v6088_v21, 16  ;;  %4916 = vxpose.xlu1.b32.cont [2/16] (narrow) %v6104_v23, 16  ;;  %v6109_v19 = vadd.f32 %v5918_v53, %v8091_v32 }
 0x205   : > { %v6106_v27 = vadd.f32 %v6105_v38, %v6053_v34  ;;  %v4804_v58 = vpop.f32.mrb[21].mxu0  ;;  %v6111_v28 = vadd.f32 %v8091_v32, %v2779_v7 }
 0x206   : > { %v6108_v20 = vadd.f32 %v6107_v57, %v4804_v58  ;;  %v6054_v59 = vpop.f32.mrb[22].mxu0 }
 0x207   : > { %v6110_v39 = vadd.f32 %v6109_v19, %v6054_v59  ;;  %v4807_v13 = vpop.f32.mrb[23].mxu0 }
 0x208   : > { %v6112_v52 = vadd.f32 %v6111_v28, %v4807_v13  ;;  %4893 = vxpose.xlu0.b32.cont [11/16] (narrow) %v6082_v22, 16  ;;  %4917 = vxpose.xlu1.b32.cont [3/16] (narrow) %v6098_v6, 16 }
 0x209   : > { %v5921_v12 = vpop.f32.mrb[24].mxu1 }
 0x20a   : > { %v2792_v56 = vpop.f32.mrb[25].mxu1  ;;  %v6113_v44 = vadd.f32 %v5921_v12, %v8091_v32 }
 0x20b   : > { %v5922_v17 = vpop.f32.mrb[26].mxu1  ;;  %v6115_v63 = vadd.f32 %v8091_v32, %v2792_v56 }
 0x20c   : > { %v2795_v16 = vpop.f32.mrb[27].mxu1  ;;  %v6057_v30 = vpop.f32.mrb[24].mxu0  ;;  %4894 = vxpose.xlu0.b32.cont [12/16] (narrow) %v8105_v50, 16  ;;  %4918 = vxpose.xlu1.b32.cont [4/16] (narrow) %v6102_v41, 16  ;;  %v6117_v55 = vadd.f32 %v5922_v17, %v8091_v32 }
 0x20d   : > { %v6114_v11 = vadd.f32 %v6113_v44, %v6057_v30  ;;  %v4820_v36 = vpop.f32.mrb[25].mxu0  ;;  %v6119_v31 = vadd.f32 %v8091_v32, %v2795_v16 }
 0x20e   : > { %v6116_v24 = vadd.f32 %v6115_v63, %v4820_v36  ;;  %v6058_v22 = vpop.f32.mrb[26].mxu0 }
 0x20f   : > { %v6118_v48 = vadd.f32 %v6117_v55, %v6058_v22  ;;  %v4823_v5 = vpop.f32.mrb[27].mxu0 }
 0x210   : > { %v6120_v10 = vadd.f32 %v6119_v31, %v4823_v5  ;;  %4895 = vxpose.xlu0.b32.cont [13/16] (narrow) %v8113_v45, 16  ;;  %4919 = vxpose.xlu1.b32.cont [5/16] (narrow) %v6108_v20, 16 }
 0x211   : > { %v5925_v4 = vpop.f32.mrb[28].mxu1 }
 0x212   : > { %v2808_v21 = vpop.f32.mrb[29].mxu1  ;;  %v6121_v50 = vadd.f32 %v5925_v4, %v8091_v32 }
 0x213   : > { %v5926_v14 = vpop.f32.mrb[30].mxu1  ;;  %v6123_v49 = vadd.f32 %v8091_v32, %v2808_v21 }
 0x214   : > { %v2811_v60 = vpop.f32.mrb[31].mxu1  ;;  %v6061_v3 = vpop.f32.mrb[28].mxu0  ;;  %4896 = vxpose.xlu0.b32.cont [14/16] (narrow) %v8117_v1, 16  ;;  %4920 = vxpose.xlu1.b32.cont [6/16] (narrow) %v6112_v52, 16  ;;  %v6125_v43 = vadd.f32 %v5926_v14, %v8091_v32 }
 0x215   : > { %v6122_v37 = vadd.f32 %v6121_v50, %v6061_v3  ;;  %v4836_v51 = vpop.f32.mrb[29].mxu0  ;;  %v6127_v61 = vadd.f32 %v8091_v32, %v2811_v60 }
 0x216   : > { %v6124_v47 = vadd.f32 %v6123_v49, %v4836_v51  ;;  %v6062_v45 = vpop.f32.mrb[30].mxu0 }
 0x217   : > { %v6126_v46 = vadd.f32 %v6125_v43, %v6062_v45  ;;  %v4839_v0 = vpop.f32.mrb[31].mxu0 }
 0x218   : > { %v6128_v8 = vadd.f32 %v6127_v61, %v4839_v0  ;;  %4897 = vxpose.xlu0.b32.cont [15/16] (narrow) %v8110_v29, 16  ;;  %4921 = vxpose.xlu1.b32.cont [7/16] (narrow) %v6106_v27, 16 }
 0x21c   : > { %4898 = vxpose.xlu0.b32.end [16/16] (narrow) %v8115_v2, 16  ;;  %4922 = vxpose.xlu1.b32.cont [8/16] (narrow) %v6110_v39, 16 }
 0x220   : > { %4923 = vxpose.xlu1.b32.cont [9/16] (narrow) %v6116_v24, 16 }
 0x224   : > { %4924 = vxpose.xlu1.b32.cont [10/16] (narrow) %v6120_v10, 16 }
 0x228   : > { %4925 = vxpose.xlu1.b32.cont [11/16] (narrow) %v6114_v11, 16 }
 0x22c   : > { %4926 = vxpose.xlu1.b32.cont [12/16] (narrow) %v6118_v48, 16 }
 0x230   : > { %4927 = vxpose.xlu1.b32.cont [13/16] (narrow) %v6124_v47, 16 }
 0x234   : > { %4928 = vxpose.xlu1.b32.cont [14/16] (narrow) %v6128_v8, 16 }
 0x238   : > { %4929 = vxpose.xlu1.b32.cont [15/16] (narrow) %v6122_v37, 16 }
 0x23c   : > { %4930 = vxpose.xlu1.b32.end [16/16] (narrow) %v6126_v46, 16 }
 0x260   : > { %v4899_v32 = vpop.trf.xlu0 }
 0x264   : > { %v4900_v1 = vpop.trf.xlu0 }
 0x265   : > { %v5599_v26 = vmul.f32 -1.442695, %v4900_v1 }
 0x267   : > { %6436 = vpow2.f32 %v5599_v26 }
 0x271   : > { %v6437_v35 = vpop.eup %6436 }
 0x272   : > { %v4953_v9 = vadd.f32 1.0, %v6437_v35 }
 0x274   : > { %6438 = vrcp.f32 %v4953_v9 }
 0x27e   : > { %v6439_v29 = vpop.eup %6438 }
 0x27f   : > { %v4959_v2 = vmul.f32 %v6439_v29, %v4899_v32 }
 0x280   : > { %v4931_v42 = vpop.trf.xlu1 }
 0x281   : > { %4961 = vst [vmem:[%s192_s22] sm:$0xff] %v4959_v2 }
 0x284   : > { %v4932_v6 = vpop.trf.xlu1 }
 0x285   : > { %v5600_v15 = vmul.f32 -1.442695, %v4932_v6 }
 0x287   : > { %6440 = vpow2.f32 %v5600_v15 }
 0x291   : > { %v6441_v25 = vpop.eup %6440 }
 0x292   : > { %v4954_v62 = vadd.f32 1.0, %v6441_v25 }
 0x294   : > { %6442 = vrcp.f32 %v4954_v62 }
 0x29e   : > { %v6443_v18 = vpop.eup %6442 }
 0x29f   : > { %v4960_v41 = vmul.f32 %v6443_v18, %v4931_v42 }
 0x2a1   : > { %4962 = vst [vmem:[%s192_s22 + $0x8] sm:$0xff] %v4960_v41 }
 0x2a2 PF: > { %s13_s14 = sadd.s32 1, %s6482_s14   ;;  %s8163_s12 = smov %s6478_s13 }
 0x2a3   : > { %p10_p5 = scmp.ge.s32.totalorder %s13_s14, 4   ;;  %s8164_s13 = smov %s8166_s15 }
 0x2a5   :  { %12 = sbr.rel (!%p10_p5) target bundleno = 2 (0x2), region = 73 }

</bundles_post_ra>
